<compile_context>
chip_gen: v7x
topology: tpu7x:2x2x1
jax: 0.10.0
libtpu: 0.0.40
codegen_flags: <defaults>
</compile_context>

<pallas_src>
import jax
import jax.numpy as jnp
from jax import lax
from jax.experimental import pallas as pl
from jax.experimental.pallas import tpu as pltpu

F_THRES = 30                  # cfg['f_thres'] — max fixed-point solver iterations
MXU_DTYPE = jnp.bfloat16      # MXU operand dtype (bf16-native on v5e/v6e/v7x);
                              # accumulation + elementwise chain stay float32.


def deq_fixed_point_kernel(x_ref, wx_ref, wz_ref, b_ref, z_ref):
    """One (C, L) tile of the DEQ fixed-point solve (L = lane-dense spatial dim).

    x_ref : (C, L)  input tile (injection source), channels on sublanes
    wx_ref: (C, C)  input-injection weight
    wz_ref: (C, C)  recurrent weight (contractive)
    b_ref : (C, 1)  bias
    z_ref : (C, L)  output tile: z* such that z* = f(z*, x)
    """
    x = x_ref[...].astype(MXU_DTYPE)
    # Input injection u = Wx @ x + b: computed once, reused every solver step.
    u = jnp.dot(wx_ref[...].astype(MXU_DTYPE), x,
                preferred_element_type=jnp.float32) + b_ref[...]
    # Hoist the recurrent weight load + cast out of the solver loop.
    wz = wz_ref[...].astype(MXU_DTYPE)

    def body(_, z):
        # z_{k+1} = f(z_k, x) = tanh(Wz @ z_k + u); matmul bf16->f32, rest f32.
        return jnp.tanh(
            jnp.dot(wz, z.astype(MXU_DTYPE),
                    preferred_element_type=jnp.float32) + u)

    # z1 = 0; fixed trip count -> fully unrolled for scheduler visibility.
    z_star = lax.fori_loop(0, F_THRES, body, jnp.zeros_like(u), unroll=True)
    z_ref[...] = z_star.astype(z_ref.dtype)


def _pick_tile_hw(hw, target=512):
    """Largest lane-tile <= target that divides hw and is a multiple of 128
    (falls back to the full extent, which is always layout-legal)."""
    if hw % 128 != 0 or hw <= target:
        return hw
    best = 128
    for t in range(128, target + 1, 128):
        if hw % t == 0:
            best = t
    return best


def deq_layer_forward(x, wx, wz, b):
    """Pallas-backed DEQLayer.forward (deq_mode=True, not training).

    Returns (new_z1, jac_loss, sradius) with the same shapes/semantics as the
    PyTorch module: new_z1 has x's shape, jac_loss is (1, 1) zeros, sradius is
    (bsz, 1) zeros.
    """
    B, C, H, W = x.shape
    HW = H * W
    # NCHW consumed directly as (B, C, H*W): no transposes, channels on
    # sublanes, spatial on lanes.
    x3 = x.reshape(B, C, HW)

    tile_hw = _pick_tile_hw(HW)
    n_hw = HW // tile_hw

    z3 = pl.pallas_call(
        deq_fixed_point_kernel,
        out_shape=jax.ShapeDtypeStruct((B, C, HW), x.dtype),
        grid_spec=pltpu.PrefetchScalarGridSpec(
            num_scalar_prefetch=0,
            grid=(B, n_hw),
            in_specs=[
                pl.BlockSpec((None, C, tile_hw), lambda bi, j: (bi, 0, j)),  # x
                pl.BlockSpec((C, C), lambda bi, j: (0, 0)),                  # Wx
                pl.BlockSpec((C, C), lambda bi, j: (0, 0)),                  # Wz
                pl.BlockSpec((C, 1), lambda bi, j: (0, 0)),                  # bias
            ],
            out_specs=pl.BlockSpec((None, C, tile_hw), lambda bi, j: (bi, 0, j)),
        ),
        compiler_params=pltpu.CompilerParams(
            dimension_semantics=("parallel", "parallel"),
        ),
    )(x3, wx, wz, b)

    new_z1 = z3.reshape(B, C, H, W)
    jac_loss = jnp.zeros((1, 1), x.dtype)   # torch.tensor(0.0).view(1, -1)
    sradius = jnp.zeros((B, 1), x.dtype)    # torch.zeros(bsz, 1).view(-1, 1)
    return new_z1, jac_loss, sradius


def _reference(x, wx, wz, b, *, mirror_kernel_dtypes=True):
    """Pure-JAX reference of the same forward.

    mirror_kernel_dtypes=True reproduces the kernel's arithmetic exactly
    (bf16 MXU operands, f32 accumulation/elementwise); False is a full-f32
    baseline used to bound the bf16-operand error of the fixed point.
    """
    B, C, H, W = x.shape
    x3 = x.reshape(B, C, H * W).astype(jnp.float32)
    if mirror_kernel_dtypes:
        cast = lambda a: a.astype(MXU_DTYPE)
        prec = None
    else:
        cast = lambda a: a
        prec = lax.Precision.HIGHEST
    u = jnp.einsum('ij,bjl->bil', cast(wx), cast(x3),
                   preferred_element_type=jnp.float32, precision=prec) + b[None]
    wz_c = cast(wz)
    z = jnp.zeros_like(u)
    for _ in range(F_THRES):
        z = jnp.tanh(jnp.einsum('ij,bjl->bil', wz_c, cast(z),
                                preferred_element_type=jnp.float32,
                                precision=prec) + u)
    return z.reshape(B, C, H, W).astype(x.dtype)


if __name__ == "__main__":
    B, C, H, W = 2, 32, 16, 16   # small NCHW input (C = hidden width of f)

    key = jax.random.PRNGKey(0)
    kx, kwx, kwz, kb = jax.random.split(key, 4)

    x = jax.random.normal(kx, (B, C, H, W), dtype=jnp.float32)
    # Deterministic parameter init; Wz scaled to be contractive so the
    # fixed-point iteration converges (standard DEQ requirement on f).
    wx = jax.random.normal(kwx, (C, C), dtype=jnp.float32) / jnp.sqrt(C)
    wz = jax.random.normal(kwz, (C, C), dtype=jnp.float32) * (0.3 / jnp.sqrt(C))
    b = jax.random.normal(kb, (C, 1), dtype=jnp.float32) * 0.1

    new_z1, jac_loss, sradius = deq_layer_forward(x, wx, wz, b)
    jax.block_until_ready((new_z1, jac_loss, sradius))

    # Correctness: (1) exact-arithmetic mirror of the kernel (tight tolerance),
    # (2) full-f32 baseline (loose tolerance bounding the bf16-operand error).
    ref_mirror = _reference(x, wx, wz, b, mirror_kernel_dtypes=True)
    ref_f32 = _reference(x, wx, wz, b, mirror_kernel_dtypes=False)

    assert new_z1.shape == x.shape
    assert jac_loss.shape == (1, 1)
    assert sradius.shape == (B, 1)
    assert jnp.max(jnp.abs(new_z1 - ref_mirror)) < 1e-4
    assert jnp.max(jnp.abs(new_z1 - ref_f32)) < 5e-2

    print("KERNEL_OK")
</pallas_src>

<mosaic_0001>
module attributes {stable_mosaic.version = 11 : i64} {
  func.func @deq_fixed_point_kernel(%arg0: i32, %arg1: i32, %arg2: memref<1x32x256xf32, #tpu.memory_space<vmem>>, %arg3: memref<32x32xf32, #tpu.memory_space<vmem>>, %arg4: memref<32x32xf32, #tpu.memory_space<vmem>>, %arg5: memref<32x1xf32, #tpu.memory_space<vmem>>, %arg6: memref<1x32x256xf32, #tpu.memory_space<vmem>>) attributes {dimension_semantics = [#tpu.dimension_semantics<parallel>, #tpu.dimension_semantics<parallel>], iteration_bounds = array<i64: 2, 1>, scalar_prefetch = 0 : i64, scratch_operands = 0 : i64, tpu.core_type = #tpu.core_type<tc>, window_params = [{transform_indices = @transform_0, window_bounds = array<i64: 1, 32, 256>}, {pipeline_mode = #tpu.pipeline_mode<synchronous>, transform_indices = @transform_1, window_bounds = array<i64: 32, 32>}, {pipeline_mode = #tpu.pipeline_mode<synchronous>, transform_indices = @transform_2, window_bounds = array<i64: 32, 32>}, {pipeline_mode = #tpu.pipeline_mode<synchronous>, transform_indices = @transform_3, window_bounds = array<i64: 32, 1>}, {transform_indices = @transform_4, window_bounds = array<i64: 1, 32, 256>}]} {
    %c0 = arith.constant 0 : index
    %c0_0 = arith.constant 0 : index
    %c0_1 = arith.constant 0 : index
    %0 = vector.load %arg2[%c0, %c0_0, %c0_1] : memref<1x32x256xf32, #tpu.memory_space<vmem>>, vector<1x32x256xf32>
    %1 = vector.shape_cast %0 : vector<1x32x256xf32> to vector<32x256xf32>
    %2 = arith.truncf %1 : vector<32x256xf32> to vector<32x256xbf16>
    %c0_2 = arith.constant 0 : index
    %c0_3 = arith.constant 0 : index
    %3 = vector.load %arg3[%c0_2, %c0_3] : memref<32x32xf32, #tpu.memory_space<vmem>>, vector<32x32xf32>
    %4 = arith.truncf %3 : vector<32x32xf32> to vector<32x32xbf16>
    %cst = arith.constant dense<0.000000e+00> : vector<32x256xf32>
    %5 = tpu.matmul %4, %2, %cst {dimension_numbers = #tpu.dot_dimension_numbers<[1], [0], [0], [1], [0, 0, 1, 1], [], []>} : vector<32x32xbf16>, vector<32x256xbf16>, vector<32x256xf32> -> vector<32x256xf32>
    %c0_4 = arith.constant 0 : index
    %c0_5 = arith.constant 0 : index
    %6 = vector.load %arg5[%c0_4, %c0_5] : memref<32x1xf32, #tpu.memory_space<vmem>>, vector<32x1xf32>
    %7 = vector.broadcast %6 : vector<32x1xf32> to vector<32x256xf32>
    %8 = arith.addf %5, %7 : vector<32x256xf32>
    %c0_6 = arith.constant 0 : index
    %c0_7 = arith.constant 0 : index
    %9 = vector.load %arg4[%c0_6, %c0_7] : memref<32x32xf32, #tpu.memory_space<vmem>>, vector<32x32xf32>
    %10 = arith.truncf %9 : vector<32x32xf32> to vector<32x32xbf16>
    %cst_8 = arith.constant 0.000000e+00 : f32
    %11 = vector.broadcast %cst_8 : f32 to vector<32x256xf32>
    %c0_i32 = arith.constant 0 : i32
    %12 = arith.truncf %11 : vector<32x256xf32> to vector<32x256xbf16>
    %cst_9 = arith.constant dense<0.000000e+00> : vector<32x256xf32>
    %13 = tpu.matmul %10, %12, %cst_9 {dimension_numbers = #tpu.dot_dimension_numbers<[1], [0], [0], [1], [0, 0, 1, 1], [], []>} : vector<32x32xbf16>, vector<32x256xbf16>, vector<32x256xf32> -> vector<32x256xf32>
    %14 = arith.addf %13, %8 : vector<32x256xf32>
    %15 = math.tanh %14 : vector<32x256xf32>
    %c1_i32 = arith.constant 1 : i32
    %16 = arith.truncf %15 : vector<32x256xf32> to vector<32x256xbf16>
    %cst_10 = arith.constant dense<0.000000e+00> : vector<32x256xf32>
    %17 = tpu.matmul %10, %16, %cst_10 {dimension_numbers = #tpu.dot_dimension_numbers<[1], [0], [0], [1], [0, 0, 1, 1], [], []>} : vector<32x32xbf16>, vector<32x256xbf16>, vector<32x256xf32> -> vector<32x256xf32>
    %18 = arith.addf %17, %8 : vector<32x256xf32>
    %19 = math.tanh %18 : vector<32x256xf32>
    %c2_i32 = arith.constant 2 : i32
    %20 = arith.truncf %19 : vector<32x256xf32> to vector<32x256xbf16>
    %cst_11 = arith.constant dense<0.000000e+00> : vector<32x256xf32>
    %21 = tpu.matmul %10, %20, %cst_11 {dimension_numbers = #tpu.dot_dimension_numbers<[1], [0], [0], [1], [0, 0, 1, 1], [], []>} : vector<32x32xbf16>, vector<32x256xbf16>, vector<32x256xf32> -> vector<32x256xf32>
    %22 = arith.addf %21, %8 : vector<32x256xf32>
    %23 = math.tanh %22 : vector<32x256xf32>
    %c3_i32 = arith.constant 3 : i32
    %24 = arith.truncf %23 : vector<32x256xf32> to vector<32x256xbf16>
    %cst_12 = arith.constant dense<0.000000e+00> : vector<32x256xf32>
    %25 = tpu.matmul %10, %24, %cst_12 {dimension_numbers = #tpu.dot_dimension_numbers<[1], [0], [0], [1], [0, 0, 1, 1], [], []>} : vector<32x32xbf16>, vector<32x256xbf16>, vector<32x256xf32> -> vector<32x256xf32>
    %26 = arith.addf %25, %8 : vector<32x256xf32>
    %27 = math.tanh %26 : vector<32x256xf32>
    %c4_i32 = arith.constant 4 : i32
    %28 = arith.truncf %27 : vector<32x256xf32> to vector<32x256xbf16>
    %cst_13 = arith.constant dense<0.000000e+00> : vector<32x256xf32>
    %29 = tpu.matmul %10, %28, %cst_13 {dimension_numbers = #tpu.dot_dimension_numbers<[1], [0], [0], [1], [0, 0, 1, 1], [], []>} : vector<32x32xbf16>, vector<32x256xbf16>, vector<32x256xf32> -> vector<32x256xf32>
    %30 = arith.addf %29, %8 : vector<32x256xf32>
    %31 = math.tanh %30 : vector<32x256xf32>
    %c5_i32 = arith.constant 5 : i32
    %32 = arith.truncf %31 : vector<32x256xf32> to vector<32x256xbf16>
    %cst_14 = arith.constant dense<0.000000e+00> : vector<32x256xf32>
    %33 = tpu.matmul %10, %32, %cst_14 {dimension_numbers = #tpu.dot_dimension_numbers<[1], [0], [0], [1], [0, 0, 1, 1], [], []>} : vector<32x32xbf16>, vector<32x256xbf16>, vector<32x256xf32> -> vector<32x256xf32>
    %34 = arith.addf %33, %8 : vector<32x256xf32>
    %35 = math.tanh %34 : vector<32x256xf32>
    %c6_i32 = arith.constant 6 : i32
    %36 = arith.truncf %35 : vector<32x256xf32> to vector<32x256xbf16>
    %cst_15 = arith.constant dense<0.000000e+00> : vector<32x256xf32>
    %37 = tpu.matmul %10, %36, %cst_15 {dimension_numbers = #tpu.dot_dimension_numbers<[1], [0], [0], [1], [0, 0, 1, 1], [], []>} : vector<32x32xbf16>, vector<32x256xbf16>, vector<32x256xf32> -> vector<32x256xf32>
    %38 = arith.addf %37, %8 : vector<32x256xf32>
    %39 = math.tanh %38 : vector<32x256xf32>
    %c7_i32 = arith.constant 7 : i32
    %40 = arith.truncf %39 : vector<32x256xf32> to vector<32x256xbf16>
    %cst_16 = arith.constant dense<0.000000e+00> : vector<32x256xf32>
    %41 = tpu.matmul %10, %40, %cst_16 {dimension_numbers = #tpu.dot_dimension_numbers<[1], [0], [0], [1], [0, 0, 1, 1], [], []>} : vector<32x32xbf16>, vector<32x256xbf16>, vector<32x256xf32> -> vector<32x256xf32>
    %42 = arith.addf %41, %8 : vector<32x256xf32>
    %43 = math.tanh %42 : vector<32x256xf32>
    %c8_i32 = arith.constant 8 : i32
    %44 = arith.truncf %43 : vector<32x256xf32> to vector<32x256xbf16>
    %cst_17 = arith.constant dense<0.000000e+00> : vector<32x256xf32>
    %45 = tpu.matmul %10, %44, %cst_17 {dimension_numbers = #tpu.dot_dimension_numbers<[1], [0], [0], [1], [0, 0, 1, 1], [], []>} : vector<32x32xbf16>, vector<32x256xbf16>, vector<32x256xf32> -> vector<32x256xf32>
    %46 = arith.addf %45, %8 : vector<32x256xf32>
    %47 = math.tanh %46 : vector<32x256xf32>
    %c9_i32 = arith.constant 9 : i32
    %48 = arith.truncf %47 : vector<32x256xf32> to vector<32x256xbf16>
    %cst_18 = arith.constant dense<0.000000e+00> : vector<32x256xf32>
    %49 = tpu.matmul %10, %48, %cst_18 {dimension_numbers = #tpu.dot_dimension_numbers<[1], [0], [0], [1], [0, 0, 1, 1], [], []>} : vector<32x32xbf16>, vector<32x256xbf16>, vector<32x256xf32> -> vector<32x256xf32>
    %50 = arith.addf %49, %8 : vector<32x256xf32>
    %51 = math.tanh %50 : vector<32x256xf32>
    %c10_i32 = arith.constant 10 : i32
    %52 = arith.truncf %51 : vector<32x256xf32> to vector<32x256xbf16>
    %cst_19 = arith.constant dense<0.000000e+00> : vector<32x256xf32>
    %53 = tpu.matmul %10, %52, %cst_19 {dimension_numbers = #tpu.dot_dimension_numbers<[1], [0], [0], [1], [0, 0, 1, 1], [], []>} : vector<32x32xbf16>, vector<32x256xbf16>, vector<32x256xf32> -> vector<32x256xf32>
    %54 = arith.addf %53, %8 : vector<32x256xf32>
    %55 = math.tanh %54 : vector<32x256xf32>
    %c11_i32 = arith.constant 11 : i32
    %56 = arith.truncf %55 : vector<32x256xf32> to vector<32x256xbf16>
    %cst_20 = arith.constant dense<0.000000e+00> : vector<32x256xf32>
    %57 = tpu.matmul %10, %56, %cst_20 {dimension_numbers = #tpu.dot_dimension_numbers<[1], [0], [0], [1], [0, 0, 1, 1], [], []>} : vector<32x32xbf16>, vector<32x256xbf16>, vector<32x256xf32> -> vector<32x256xf32>
    %58 = arith.addf %57, %8 : vector<32x256xf32>
    %59 = math.tanh %58 : vector<32x256xf32>
    %c12_i32 = arith.constant 12 : i32
    %60 = arith.truncf %59 : vector<32x256xf32> to vector<32x256xbf16>
    %cst_21 = arith.constant dense<0.000000e+00> : vector<32x256xf32>
    %61 = tpu.matmul %10, %60, %cst_21 {dimension_numbers = #tpu.dot_dimension_numbers<[1], [0], [0], [1], [0, 0, 1, 1], [], []>} : vector<32x32xbf16>, vector<32x256xbf16>, vector<32x256xf32> -> vector<32x256xf32>
    %62 = arith.addf %61, %8 : vector<32x256xf32>
    %63 = math.tanh %62 : vector<32x256xf32>
    %c13_i32 = arith.constant 13 : i32
    %64 = arith.truncf %63 : vector<32x256xf32> to vector<32x256xbf16>
    %cst_22 = arith.constant dense<0.000000e+00> : vector<32x256xf32>
    %65 = tpu.matmul %10, %64, %cst_22 {dimension_numbers = #tpu.dot_dimension_numbers<[1], [0], [0], [1], [0, 0, 1, 1], [], []>} : vector<32x32xbf16>, vector<32x256xbf16>, vector<32x256xf32> -> vector<32x256xf32>
    %66 = arith.addf %65, %8 : vector<32x256xf32>
    %67 = math.tanh %66 : vector<32x256xf32>
    %c14_i32 = arith.constant 14 : i32
    %68 = arith.truncf %67 : vector<32x256xf32> to vector<32x256xbf16>
    %cst_23 = arith.constant dense<0.000000e+00> : vector<32x256xf32>
    %69 = tpu.matmul %10, %68, %cst_23 {dimension_numbers = #tpu.dot_dimension_numbers<[1], [0], [0], [1], [0, 0, 1, 1], [], []>} : vector<32x32xbf16>, vector<32x256xbf16>, vector<32x256xf32> -> vector<32x256xf32>
    %70 = arith.addf %69, %8 : vector<32x256xf32>
    %71 = math.tanh %70 : vector<32x256xf32>
    %c15_i32 = arith.constant 15 : i32
    %72 = arith.truncf %71 : vector<32x256xf32> to vector<32x256xbf16>
    %cst_24 = arith.constant dense<0.000000e+00> : vector<32x256xf32>
    %73 = tpu.matmul %10, %72, %cst_24 {dimension_numbers = #tpu.dot_dimension_numbers<[1], [0], [0], [1], [0, 0, 1, 1], [], []>} : vector<32x32xbf16>, vector<32x256xbf16>, vector<32x256xf32> -> vector<32x256xf32>
    %74 = arith.addf %73, %8 : vector<32x256xf32>
    %75 = math.tanh %74 : vector<32x256xf32>
    %c16_i32 = arith.constant 16 : i32
    %76 = arith.truncf %75 : vector<32x256xf32> to vector<32x256xbf16>
    %cst_25 = arith.constant dense<0.000000e+00> : vector<32x256xf32>
    %77 = tpu.matmul %10, %76, %cst_25 {dimension_numbers = #tpu.dot_dimension_numbers<[1], [0], [0], [1], [0, 0, 1, 1], [], []>} : vector<32x32xbf16>, vector<32x256xbf16>, vector<32x256xf32> -> vector<32x256xf32>
    %78 = arith.addf %77, %8 : vector<32x256xf32>
    %79 = math.tanh %78 : vector<32x256xf32>
    %c17_i32 = arith.constant 17 : i32
    %80 = arith.truncf %79 : vector<32x256xf32> to vector<32x256xbf16>
    %cst_26 = arith.constant dense<0.000000e+00> : vector<32x256xf32>
    %81 = tpu.matmul %10, %80, %cst_26 {dimension_numbers = #tpu.dot_dimension_numbers<[1], [0], [0], [1], [0, 0, 1, 1], [], []>} : vector<32x32xbf16>, vector<32x256xbf16>, vector<32x256xf32> -> vector<32x256xf32>
    %82 = arith.addf %81, %8 : vector<32x256xf32>
    %83 = math.tanh %82 : vector<32x256xf32>
    %c18_i32 = arith.constant 18 : i32
    %84 = arith.truncf %83 : vector<32x256xf32> to vector<32x256xbf16>
    %cst_27 = arith.constant dense<0.000000e+00> : vector<32x256xf32>
    %85 = tpu.matmul %10, %84, %cst_27 {dimension_numbers = #tpu.dot_dimension_numbers<[1], [0], [0], [1], [0, 0, 1, 1], [], []>} : vector<32x32xbf16>, vector<32x256xbf16>, vector<32x256xf32> -> vector<32x256xf32>
    %86 = arith.addf %85, %8 : vector<32x256xf32>
    %87 = math.tanh %86 : vector<32x256xf32>
    %c19_i32 = arith.constant 19 : i32
    %88 = arith.truncf %87 : vector<32x256xf32> to vector<32x256xbf16>
    %cst_28 = arith.constant dense<0.000000e+00> : vector<32x256xf32>
    %89 = tpu.matmul %10, %88, %cst_28 {dimension_numbers = #tpu.dot_dimension_numbers<[1], [0], [0], [1], [0, 0, 1, 1], [], []>} : vector<32x32xbf16>, vector<32x256xbf16>, vector<32x256xf32> -> vector<32x256xf32>
    %90 = arith.addf %89, %8 : vector<32x256xf32>
    %91 = math.tanh %90 : vector<32x256xf32>
    %c20_i32 = arith.constant 20 : i32
    %92 = arith.truncf %91 : vector<32x256xf32> to vector<32x256xbf16>
    %cst_29 = arith.constant dense<0.000000e+00> : vector<32x256xf32>
    %93 = tpu.matmul %10, %92, %cst_29 {dimension_numbers = #tpu.dot_dimension_numbers<[1], [0], [0], [1], [0, 0, 1, 1], [], []>} : vector<32x32xbf16>, vector<32x256xbf16>, vector<32x256xf32> -> vector<32x256xf32>
    %94 = arith.addf %93, %8 : vector<32x256xf32>
    %95 = math.tanh %94 : vector<32x256xf32>
    %c21_i32 = arith.constant 21 : i32
    %96 = arith.truncf %95 : vector<32x256xf32> to vector<32x256xbf16>
    %cst_30 = arith.constant dense<0.000000e+00> : vector<32x256xf32>
    %97 = tpu.matmul %10, %96, %cst_30 {dimension_numbers = #tpu.dot_dimension_numbers<[1], [0], [0], [1], [0, 0, 1, 1], [], []>} : vector<32x32xbf16>, vector<32x256xbf16>, vector<32x256xf32> -> vector<32x256xf32>
    %98 = arith.addf %97, %8 : vector<32x256xf32>
    %99 = math.tanh %98 : vector<32x256xf32>
    %c22_i32 = arith.constant 22 : i32
    %100 = arith.truncf %99 : vector<32x256xf32> to vector<32x256xbf16>
    %cst_31 = arith.constant dense<0.000000e+00> : vector<32x256xf32>
    %101 = tpu.matmul %10, %100, %cst_31 {dimension_numbers = #tpu.dot_dimension_numbers<[1], [0], [0], [1], [0, 0, 1, 1], [], []>} : vector<32x32xbf16>, vector<32x256xbf16>, vector<32x256xf32> -> vector<32x256xf32>
    %102 = arith.addf %101, %8 : vector<32x256xf32>
    %103 = math.tanh %102 : vector<32x256xf32>
    %c23_i32 = arith.constant 23 : i32
    %104 = arith.truncf %103 : vector<32x256xf32> to vector<32x256xbf16>
    %cst_32 = arith.constant dense<0.000000e+00> : vector<32x256xf32>
    %105 = tpu.matmul %10, %104, %cst_32 {dimension_numbers = #tpu.dot_dimension_numbers<[1], [0], [0], [1], [0, 0, 1, 1], [], []>} : vector<32x32xbf16>, vector<32x256xbf16>, vector<32x256xf32> -> vector<32x256xf32>
    %106 = arith.addf %105, %8 : vector<32x256xf32>
    %107 = math.tanh %106 : vector<32x256xf32>
    %c24_i32 = arith.constant 24 : i32
    %108 = arith.truncf %107 : vector<32x256xf32> to vector<32x256xbf16>
    %cst_33 = arith.constant dense<0.000000e+00> : vector<32x256xf32>
    %109 = tpu.matmul %10, %108, %cst_33 {dimension_numbers = #tpu.dot_dimension_numbers<[1], [0], [0], [1], [0, 0, 1, 1], [], []>} : vector<32x32xbf16>, vector<32x256xbf16>, vector<32x256xf32> -> vector<32x256xf32>
    %110 = arith.addf %109, %8 : vector<32x256xf32>
    %111 = math.tanh %110 : vector<32x256xf32>
    %c25_i32 = arith.constant 25 : i32
    %112 = arith.truncf %111 : vector<32x256xf32> to vector<32x256xbf16>
    %cst_34 = arith.constant dense<0.000000e+00> : vector<32x256xf32>
    %113 = tpu.matmul %10, %112, %cst_34 {dimension_numbers = #tpu.dot_dimension_numbers<[1], [0], [0], [1], [0, 0, 1, 1], [], []>} : vector<32x32xbf16>, vector<32x256xbf16>, vector<32x256xf32> -> vector<32x256xf32>
    %114 = arith.addf %113, %8 : vector<32x256xf32>
    %115 = math.tanh %114 : vector<32x256xf32>
    %c26_i32 = arith.constant 26 : i32
    %116 = arith.truncf %115 : vector<32x256xf32> to vector<32x256xbf16>
    %cst_35 = arith.constant dense<0.000000e+00> : vector<32x256xf32>
    %117 = tpu.matmul %10, %116, %cst_35 {dimension_numbers = #tpu.dot_dimension_numbers<[1], [0], [0], [1], [0, 0, 1, 1], [], []>} : vector<32x32xbf16>, vector<32x256xbf16>, vector<32x256xf32> -> vector<32x256xf32>
    %118 = arith.addf %117, %8 : vector<32x256xf32>
    %119 = math.tanh %118 : vector<32x256xf32>
    %c27_i32 = arith.constant 27 : i32
    %120 = arith.truncf %119 : vector<32x256xf32> to vector<32x256xbf16>
    %cst_36 = arith.constant dense<0.000000e+00> : vector<32x256xf32>
    %121 = tpu.matmul %10, %120, %cst_36 {dimension_numbers = #tpu.dot_dimension_numbers<[1], [0], [0], [1], [0, 0, 1, 1], [], []>} : vector<32x32xbf16>, vector<32x256xbf16>, vector<32x256xf32> -> vector<32x256xf32>
    %122 = arith.addf %121, %8 : vector<32x256xf32>
    %123 = math.tanh %122 : vector<32x256xf32>
    %c28_i32 = arith.constant 28 : i32
    %124 = arith.truncf %123 : vector<32x256xf32> to vector<32x256xbf16>
    %cst_37 = arith.constant dense<0.000000e+00> : vector<32x256xf32>
    %125 = tpu.matmul %10, %124, %cst_37 {dimension_numbers = #tpu.dot_dimension_numbers<[1], [0], [0], [1], [0, 0, 1, 1], [], []>} : vector<32x32xbf16>, vector<32x256xbf16>, vector<32x256xf32> -> vector<32x256xf32>
    %126 = arith.addf %125, %8 : vector<32x256xf32>
    %127 = math.tanh %126 : vector<32x256xf32>
    %c29_i32 = arith.constant 29 : i32
    %128 = arith.truncf %127 : vector<32x256xf32> to vector<32x256xbf16>
    %cst_38 = arith.constant dense<0.000000e+00> : vector<32x256xf32>
    %129 = tpu.matmul %10, %128, %cst_38 {dimension_numbers = #tpu.dot_dimension_numbers<[1], [0], [0], [1], [0, 0, 1, 1], [], []>} : vector<32x32xbf16>, vector<32x256xbf16>, vector<32x256xf32> -> vector<32x256xf32>
    %130 = arith.addf %129, %8 : vector<32x256xf32>
    %131 = math.tanh %130 : vector<32x256xf32>
    %c0_39 = arith.constant 0 : index
    %c0_40 = arith.constant 0 : index
    %c0_41 = arith.constant 0 : index
    %132 = vector.load %arg6[%c0_39, %c0_40, %c0_41] : memref<1x32x256xf32, #tpu.memory_space<vmem>>, vector<1x32x256xf32>
    %133 = vector.shape_cast %132 : vector<1x32x256xf32> to vector<32x256xf32>
    %134 = vector.shape_cast %131 : vector<32x256xf32> to vector<1x32x256xf32>
    tpu.vector_store %arg6[%c0_39, %c0_40, %c0_41], %134 {strides = array<i32>} : memref<1x32x256xf32, #tpu.memory_space<vmem>>, vector<1x32x256xf32>,
    return
  }
  func.func @transform_0(%arg0: i32, %arg1: i32) -> (i32, i32, i32) {
    %c0_i32 = arith.constant 0 : i32
    %c0_i32_0 = arith.constant 0 : i32
    return %arg0, %c0_i32, %arg1 : i32, i32, i32
  }
  func.func @transform_1(%arg0: i32, %arg1: i32) -> (i32, i32) {
    %c0_i32 = arith.constant 0 : i32
    %c0_i32_0 = arith.constant 0 : i32
    %c0_i32_1 = arith.constant 0 : i32
    return %c0_i32, %c0_i32_0 : i32, i32
  }
  func.func @transform_2(%arg0: i32, %arg1: i32) -> (i32, i32) {
    %c0_i32 = arith.constant 0 : i32
    %c0_i32_0 = arith.constant 0 : i32
    %c0_i32_1 = arith.constant 0 : i32
    return %c0_i32, %c0_i32_0 : i32, i32
  }
  func.func @transform_3(%arg0: i32, %arg1: i32) -> (i32, i32) {
    %c0_i32 = arith.constant 0 : i32
    %c0_i32_0 = arith.constant 0 : i32
    %c0_i32_1 = arith.constant 0 : i32
    return %c0_i32, %c0_i32_0 : i32, i32
  }
  func.func @transform_4(%arg0: i32, %arg1: i32) -> (i32, i32, i32) {
    %c0_i32 = arith.constant 0 : i32
    %c0_i32_0 = arith.constant 0 : i32
    return %arg0, %c0_i32, %arg1 : i32, i32, i32
  }
}

</mosaic_0001>

<bundles_post_ra>
// kernel: tpu_custom_call.1
= control target key start
LH: loop header
LB: loop body
LE: loop exit
PB: predicated region body
PF: predicated region fallthrough
CT: control target
= control target key end

     0   :  { %9 = vsyncpa [#allocation3], 0  ;;  %s3959_s0 = inlined_call_operand.hbm [shape: f32[2,32,256], index: 0, kind: input, shape index: {}]   ;;  %s3960_s1 = inlined_call_operand.vmem [shape: f32[32,32], index: 1, kind: input, shape index: {}]   ;;  %s3961_s2 = inlined_call_operand.hbm [shape: f32[32,32], index: 2, kind: input, shape index: {}]   ;;  %s3962_s3 = inlined_call_operand.vmem [shape: f32[32,1], index: 3, kind: input, shape index: {}]   ;;  %s3963_s4 = inlined_call_operand.hbm [shape: f32[2,32,256], index: 4, kind: output, shape index: {}]  }
   0x1   :  { %11 = vsyncpa [#allocation3 + $0x1], 0 }
   0x2   :  { %12 = vsyncpa [#allocation6], 0 }
   0x3   :  { %13 = vsyncpa [#allocation4], 0 }
   0x4   :  { %15 = vsyncpa [#allocation4 + $0x1], 0  ;;  %s3266_s15 = smov 0   ;;  %s3268_s16 = smov 0  }
   0x5   :  { %s3270_s17 = smov 0   ;;  %s3272_s18 = smov 0  }
   0x6   :  { %s3274_s19 = smov 0   ;;  %s3276_s20 = smov 0  }
   0x7 LB: > { %s2433_s21 = sadd.s32 4294967295, %s3229_s20   ;;  %s2434_s22 = sadd.s32 4294967294, %s3229_s20   ;;  %s3229_s20 = sphi %s3276_s20, %s21_s20   ;;  %s3225_s19 = sphi %s3274_s19, %s3987_s19   ;;  %s3221_s18 = sphi %s3272_s18, %s3986_s18   ;;  %s3217_s17 = sphi %s3270_s17, %s3985_s17   ;;  %s3213_s16 = sphi %s3268_s16, %s3984_s16   ;;  %s3209_s15 = sphi %s3266_s15, %s3983_s15  }
   0x8   : > { %p55_p0 = scmp.ne.s32.totalorder %s3213_s16, %s3209_s15  ;;  %p3300_p1 = scmp.eq.s32.totalorder %s2433_s21, 0 }
   0x9   : > { %p3304_p2 = scmp.eq.s32.totalorder %s2433_s21, 1  ;;  %p150_p3 = scmp.eq.s32.totalorder %s2434_s22, 1 }
   0xa   : > { %s3968_s23 = scalar_select %p3300_p1, 1, 0 }
   0xb   : > { %s3969_s24 = scalar_select %p3304_p2, 1, 0 }
   0xc   : > { %p3310_p4 = por %p3300_p1, %p55_p0  ;;  %p2435_p5 = scmp.ge.s32.totalorder %s3229_s20, 1 }
   0xd   : > { %p3315_p6 = por %p150_p3, %p55_p0  ;;  %p157_p7 = scmp.lt.s32.totalorder %s3229_s20, 3 }
   0xe   : > { %s3970_s25 = scalar_select %p3310_p4, 1, 0 }
   0xf   : > { %s3971_s26 = scalar_select %p3315_p6, 1, 0 }
  0x10   : > { %p3320_p8 = pnand %p2435_p5, %p157_p7  ;;  %s3231_s28 = smov [#allocation5]  }
  0x11   : > { %s172_s29 = sshll.u32 %s3231_s28, 4  ;;  %s33_s5 = sadd.s32 1, %s3225_s19  ;;  %s173_s29 = int_to_ptr.vmem [resolvable:$true] %s172_s29 }
  0x12   : > { %s3972_s27 = scalar_select %p3320_p8, 1, 0 }
  0x13   : > { %p2531_p9 = pneg %p3320_p8  ;;  %s3085_s8 = scalar_lea.hbm %s3961_s2, 512 }
  0x14   : > { %p3086_p12 = scmp.ne.s32.totalorder %s3961_s2, %s3085_s8  ;;  %p3092_p5 = scmp.lt.u32.totalorder %s3085_s8, %s3961_s2 }
  0x15   : > { %p3329_p11 = pnand %p2531_p9, %p3300_p1 }
  0x17   : > { %p3087_p13 = pneg %p3329_p11 }
  0x19   : > { %p3088_p0 = pnand %p3087_p13, %p3086_p12 }
  0x1b   : > { %p3089_p3 = pneg %p3088_p0 }
  0x1d   : > { %p3094_p7 = pnand %p3092_p5, %p3089_p3 }
  0x1f   : > { %3097 = shalt.err (!%p3094_p7)
}
  0x20   : > { %s3098_s13 = scalar_lea.vmem %s173_s29, 512  ;;  %p3106_p1 = scmp.lt.s32.totalorder %s173_s29, %s173_s29 }
  0x21   : > { %p3099_p9 = scmp.ne.s32.totalorder %s173_s29, %s3098_s13  ;;  %p3107_p4 = scmp.lt.s32.totalorder %s3098_s13, %s3098_s13 }
  0x23   : > { %p3101_p10 = pnand %p3099_p9, %p3087_p13  ;;  %p3108_p8 = por %p3107_p4, %p3106_p1 }
  0x25   : > { %p3102_p6 = pneg %p3101_p10 }
  0x27   : > { %p3109_p2 = pnand %p3108_p8, %p3102_p6 }
  0x29   : > { %3112 = shalt.err (!%p3109_p2)
}
  0x2a   : > { %s3232_s14 = smov 128   ;;  %s3233_s21 = smov 8  }
  0x2b   : > { %2534 = dma.hbm_to_vmem [thread:$0]  (!%p3329_p11), %s3961_s2, 512, %s173_s29, [#allocation6], %s3232_s14, %s3232_s14, %s3233_s21  }
  0x2c   : > { %p35_p1 = scmp.ge.s32.totalorder %s33_s5, 2  ;;  %s42_s6 = sadd.s32 1, %s3217_s17 }
  0x2d   : > { %p49_p2 = scmp.ne.s32.totalorder %s3217_s17, %s3213_s16  ;;  %p50_p4 = scmp.eq.s32.totalorder %s3229_s20, 0 }
  0x2e   : > { %s3989_s5 = smov (%p35_p1, %s33_s5), 0  ;;  %p3975_p8 = scmp.ne.s32.totalorder %s3969_s24, 0 }
  0x2f   : > { %p3356_p6 = por %p50_p4, %p49_p2  ;;  %s37_s30 = ssub.s32 %s3225_s19, %s3989_s5 }
  0x30   : > { %p3362_p10 = por %p3975_p8, %p49_p2  ;;  %p2544_p12 = scmp.lt.s32.totalorder %s3229_s20, 2 }
  0x31   : > { %p40_p11 = scmp.eq.s32.totalorder %s37_s30, 0  ;;  %s189_s29 = sand.u32 1, %s3217_s17  }
  0x32   : > { %s2438_s9 = sshll.u32 %s189_s29, 6  ;;  %s2512_s11 = sshll.u32 %s3225_s19, 10 }
  0x33   : > { %s3371_s10 = scalar_select %p40_p11, %s3217_s17, %s42_s6  }
  0x34   : > { %s3377_s14 = scalar_lea.hbm %s3959_s0, %s2512_s11  ;;  %s193_s24 = scalar_lea.vmem [#allocation2], %s2438_s9 }
  0x35   : > { %s202_s21 = sshll.u32 %s193_s24, 4  ;;  %p3383_p13 = pnand %p2544_p12, %p3356_p6  ;;  %s3379_s21 = int_to_ptr.vmem [resolvable:$true] %s202_s21 }
  0x36   : > { %s3387_s28 = scalar_lea.sflag [#allocation3], %s189_s29  ;;  %s3113_s6 = scalar_lea.hbm %s3377_s14, 1024 }
  0x37   : > { %p3114_p0 = scmp.ne.s32.totalorder %s3377_s14, %s3113_s6  ;;  %p3115_p3 = pneg %p3383_p13 }
  0x38   : > { %s3118_s7 = scalar_lea.hbm %s3959_s0, 2048  ;;  %p3119_p9 = scmp.lt.u32.totalorder %s3377_s14, %s3959_s0 }
  0x39   : > { %p3116_p5 = pnand %p3115_p3, %p3114_p0  ;;  %p3120_p1 = scmp.lt.u32.totalorder %s3118_s7, %s3113_s6 }
  0x3a   : > { %p3122_p4 = scmp.lt.u32.totalorder %s3113_s6, %s3377_s14 }
  0x3b   : > { %p3117_p7 = pneg %p3116_p5  ;;  %p3121_p2 = por %p3120_p1, %p3119_p9 }
  0x3d   : > { %p3123_p6 = por %p3122_p4, %p3121_p2 }
  0x3f   : > { %p3124_p8 = pnand %p3123_p6, %p3117_p7 }
  0x41   : > { %3127 = shalt.err (!%p3124_p8)
}
  0x42   : > { %s3128_s29 = scalar_lea.vmem %s3379_s21, 1024  ;;  %s3234_s13 = smov [#allocation2]  }
  0x43   : > { %p3129_p12 = scmp.ne.s32.totalorder %s3379_s21, %s3128_s29  ;;  %s3133_s24 = sshll.u32 %s3234_s13, 4  ;;  %s3134_s24 = int_to_ptr.vmem [resolvable:$false] %s3133_s24 }
  0x44   : > { %s3135_s30 = scalar_lea.vmem %s3134_s24, 2048  ;;  %p3136_p5 = scmp.lt.s32.totalorder %s3379_s21, %s3134_s24 }
  0x45   : > { %p3131_p11 = pnand %p3129_p12, %p3115_p3  ;;  %p3137_p9 = scmp.lt.s32.totalorder %s3135_s30, %s3128_s29 }
  0x47   : > { %p3132_p0 = pneg %p3131_p11  ;;  %p3138_p1 = por %p3137_p9, %p3136_p5 }
  0x49   : > { %p3139_p2 = pnand %p3138_p1, %p3132_p0 }
  0x4b   : > { %3142 = shalt.err (!%p3139_p2)
}
  0x4c   : > { %s3235_s6 = smov 256   ;;  %s3236_s9 = smov 16  }
  0x4d   : > { %2538 = dma.hbm_to_vmem [thread:$0]  (!%p3383_p13), %s3377_s14, 1024, %s3379_s21, %s3387_s28, %s3235_s6, %s3235_s6, %s3236_s9  }
  0x4e   : > { %p3978_p3 = scmp.ne.s32.totalorder %s3972_s27, 0 }
  0x4f   : > { %s3418_s7 = sand.u32 (!%p3978_p3), 1, %s3213_s16   ;;  %p3979_p7 = scmp.ne.s32.totalorder (!%p3978_p3), %s3970_s25, 0 }
  0x50   : > { %214 = sbr.rel (%p3978_p3) target bundleno = 7371 (0x1ccb), region = 36  ;;  %s2442_s11 = sshll.u32 (!%p3978_p3), %s3418_s7, 6 }
  0x51   : > { %s217_s12 = scalar_lea.sflag (!%p3978_p3), [#allocation3], %s3418_s7  ;;  %s220_s29 = scalar_lea.vmem (!%p3978_p3), [#allocation2], %s2442_s11 }
  0x57   : > { %3196 = dma.done.wait (%p3979_p7), %s217_s12, 1024  }
  0x58   : > { %3198 = vsyncadd (%p3979_p7), %s217_s12, 4294966272  ;;  %p3980_p13 = scmp.ne.s32.totalorder %s3968_s23, 0 }
  0x5a   : > { %3200 = dma.done.wait (%p3980_p13), [#allocation6], 512  }
  0x5b   : > { %3202 = vsyncadd (%p3980_p13), [#allocation6], 4294966784  ;;  %v3237_v0 = vmov 0   ;;  %v253_v1 = vld [vmem:[%s220_s29 + $0x8] sm:$0xff]  ;;  %v255_v2 = vld [vmem:[%s220_s29 + $0x18] sm:$0xff]  ;;  %vm294_vm0 = vcmask 261120  }
  0x5c   : > { %2517 = vmatprep.subr.bf16.mxu1 %v3237_v0  ;;  %333 = vmatprep.mubr.bf16.mxu0 %v3237_v0  ;;  %v252_v3 = vld [vmem:[%s220_s29] sm:$0xff]  ;;  %v261_v4 = vpack.c.bf16 %v255_v2, %v253_v1  ;;  %v254_v5 = vld [vmem:[%s220_s29 + $0x10] sm:$0xff]  ;;  %v257_v6 = vld [vmem:[%s220_s29 + $0x28] sm:$0xff]  ;;  %s248_s27 = scalar_lea.vmem [#allocation7], %s2442_s11  ;;  %s2513_s14 = sshll.u32 %s3221_s18, 10 }
  0x5d   : > { %2518 = vmatpush3.bf16.msra.mxu1 %v3237_v0  ;;  %2603 = vset.pattern.permute.xlu0 %v3237_v0  ;;  %v259_v7 = vld [vmem:[%s220_s29 + $0x38] sm:$0xff]  ;;  %v260_v8 = vpack.c.bf16 %v254_v5, %v252_v3  ;;  %v256_v10 = vld [vmem:[%s220_s29 + $0x20] sm:$0xff]  ;;  %v258_v11 = vld [vmem:[%s220_s29 + $0x30] sm:$0xff]  ;;  %s2336_s21 = sshll.u32 %s248_s27, 4  ;;  %s3908_s13 = scalar_lea.hbm %s3963_s4, %s2513_s14  ;;  %s3910_s21 = int_to_ptr.vmem [resolvable:$true] %s2336_s21 }
  0x5e   : > { %2604 = vset.pattern.permute.xlu1 %v3237_v0  ;;  %v263_v9 = vpack.c.bf16 %v259_v7, %v257_v6  ;;  %301 = vmatprep.subr.bf16.mxu0 %v261_v4  ;;  %v264_v12 = vld [vmem:[%s3960_s1] sm:$0xff]  ;;  %v355_v14 = vld [vmem:[#allocation5 + $0x8] sm:$0xff]  ;;  %v262_v15 = vpack.c.bf16 %v258_v11, %v256_v10  ;;  %v356_v18 = vld [vmem:[#allocation5 + $0x10] sm:$0xff]  ;;  %s2321_s18 = scalar_lea.sflag [#allocation4], %s3418_s7  ;;  %s3143_s11 = scalar_lea.vmem %s3910_s21, 1024 }
  0x5f   : > { %v354_v13 = vld [vmem:[#allocation5] sm:$0xff]  ;;  %302 = vmatpush1.bf16.msra.mxu0 %v260_v8  ;;  %v265_v16 = vld [vmem:[%s3960_s1 + $0x8] sm:$0xff]  ;;  %v357_v19 = vld [vmem:[#allocation5 + $0x18] sm:$0xff]  ;;  %p3144_p4 = scmp.ne.s32.totalorder %s3910_s21, %s3143_s11  ;;  %s3238_s24 = smov [#allocation7]  }
  0x60   : > { %v3443_v17 = vpack.c.bf16 %v355_v14, %v354_v13  ;;  %303 = vmatprep.subr.bf16.mxu0 %v263_v9  ;;  %v3445_v20 = vpack.c.bf16 %v357_v19, %v356_v18  ;;  %v270_v21 = vld [vmem:[%s3962_s3] sm:$0xff]  ;;  %v272_v22 = vld [vmem:[%s3962_s3 + $0x10] sm:$0xff]  ;;  %v268_v23 = vpack.c.bf16 %v265_v16, %v264_v12  ;;  %v271_v24 = vld [vmem:[%s3962_s3 + $0x8] sm:$0xff]  ;;  %s3147_s30 = sshll.u32 %s3238_s24, 4  ;;  %s3148_s30 = int_to_ptr.vmem [resolvable:$false] %s3147_s30 }
  0x61   : > { %276 = vperm.xlu0 %2603, %v270_v21   ;;  %286 = vperm.xlu1 %2604, %v272_v22   ;;  %v273_v25 = vld [vmem:[%s3962_s3 + $0x18] sm:$0xff]  ;;  %v266_v26 = vld [vmem:[%s3960_s1 + $0x10] sm:$0xff]  ;;  %p3145_p6 = pnand %p3144_p4, %p3362_p10  ;;  %s3149_s6 = scalar_lea.vmem %s3148_s30, 2048 }
  0x62   : > { %2519 = vmatprep.mubr.msk.bf16.mxu1 %vm294_vm0, %v3443_v17  ;;  %v267_v27 = vld [vmem:[%s3960_s1 + $0x18] sm:$0xff]  ;;  %p3150_p12 = scmp.lt.s32.totalorder %s3910_s21, %s3148_s30  ;;  %p3151_p11 = scmp.lt.s32.totalorder %s3149_s6, %s3143_s11 }
  0x63   : > { %2520 = vmatmul.mubr.msk.bf16.vlgmr.msra.gmra.mrb[0].mxu1 %vm294_vm0, %v3445_v20  ;;  %304 = vmatpush1.bf16.msra.mxu0 %v262_v15  ;;  %v269_v28 = vpack.c.bf16 %v267_v27, %v266_v26  ;;  %p3146_p8 = pneg %p3145_p6 }
  0x64   : > { %463 = vmatprep.mubr.bf16.mxu1 %v3237_v0  ;;  %p3152_p0 = por %p3151_p11, %p3150_p12 }
  0x65   : > { %281 = vperm.xlu0 %2603, %v271_v24   ;;  %291 = vperm.xlu1 %2604, %v273_v25  }
  0x66   : > { %2445 = vmatmul.mubr.msk.bf16.vlgmr.msra.gmra.mrb[0].mxu0 %vm294_vm0, %v268_v23  ;;  %p3153_p5 = pnand %p3152_p0, %p3146_p8 }
  0x67   : > { %343 = vmatprep.mubr.bf16.mxu0 %v3237_v0 }
  0x6e   : > { %2446 = vmatmul.mubr.msk.bf16.gmra.mrb[4].mxu0 %vm294_vm0, %v269_v28 }
  0x6f   : > { %528 = vmatprep.mubr.bf16.mxu0 %v3237_v0 }
  0xe0   : > { %v277_v29 = vpop.permute.xlu0 %276  ;;  %v287_v43 = vpop.permute.xlu1 %286 }
  0xe4   : > { %v282_v35 = vpop.permute.xlu0 %281  ;;  %v292_v49 = vpop.permute.xlu1 %291 }
 0x136   : > { %v2521_v30 = vpop.f32.mrb[0].mxu1 }
 0x137   : > { %v400_v31 = vpop.f32.mrb[1].mxu1 }
 0x138   : > { %v2522_v32 = vpop.f32.mrb[2].mxu1 }
 0x139   : > { %v404_v33 = vpop.f32.mrb[3].mxu1  ;;  %v335_v34 = vpop.f32.mrb[0].mxu0 }
 0x13a   : > { %v3474_v36 = vadd.f32 %v335_v34, %v277_v29  ;;  %v337_v37 = vpop.f32.mrb[1].mxu0 }
 0x13b   : > { %v3476_v38 = vadd.f32 %v337_v37, %v277_v29  ;;  %v339_v39 = vpop.f32.mrb[2].mxu0 }
 0x13c   : > { %v401_v40 = vadd.f32 %v400_v31, %v3474_v36  ;;  %v3479_v41 = vadd.f32 %v339_v39, %v282_v35  ;;  %v341_v42 = vpop.f32.mrb[3].mxu0 }
 0x13d   : > { %v3481_v44 = vadd.f32 %v341_v42, %v282_v35  ;;  %2605 = vtanh.f32 %v3476_v38 }
 0x13e   : > { %2607 = vtanh.f32 %v401_v40  ;;  %v405_v45 = vadd.f32 %v404_v33, %v3479_v41 }
 0x13f   : > { %2609 = vtanh.f32 %v3481_v44 }
 0x140   : > { %2611 = vtanh.f32 %v405_v45 }
 0x141   : > { %v345_v46 = vpop.f32.mrb[4].mxu0 }
 0x142   : > { %v3486_v47 = vadd.f32 %v345_v46, %v287_v43  ;;  %v347_v48 = vpop.f32.mrb[5].mxu0 }
 0x143   : > { %v3488_v50 = vadd.f32 %v347_v48, %v287_v43  ;;  %v349_v51 = vpop.f32.mrb[6].mxu0 }
 0x144   : > { %v3490_v52 = vadd.f32 %v349_v51, %v292_v49  ;;  %v351_v53 = vpop.f32.mrb[7].mxu0  ;;  %v411_v54 = vadd.f32 %v2521_v30, %v3486_v47 }
 0x145   : > { %v3493_v55 = vadd.f32 %v351_v53, %v292_v49  ;;  %2613 = vtanh.f32 %v3488_v50 }
 0x146   : > { %v415_v56 = vadd.f32 %v2522_v32, %v3490_v52  ;;  %2615 = vtanh.f32 %v411_v54 }
 0x147   : > { %v2606_v57 = vpop.eup %2605  ;;  %2617 = vtanh.f32 %v3493_v55 }
 0x148   : > { %v2608_v58 = vpop.eup %2607  ;;  %2619 = vtanh.f32 %v415_v56 }
 0x149   : > { %v2610_v59 = vpop.eup %2609 }
 0x14a   : > { %v2612_v60 = vpop.eup %2611  ;;  %v428_v61 = vpack.c.bf16 %v2610_v59, %v2606_v57 }
 0x14b   : > { %v427_v62 = vpack.c.bf16 %v2612_v60, %v2608_v58 }
 0x14c   : > { %431 = vmatprep.subr.bf16.mxu1 %v428_v61 }
 0x14d   : > { %432 = vmatpush1.bf16.msra.mxu1 %v427_v62 }
 0x14f   : > { %v2614_v63 = vpop.eup %2613 }
 0x150   : > { %v2616_v1 = vpop.eup %2615 }
 0x151   : > { %v2618_v2 = vpop.eup %2617 }
 0x152   : > { %v2620_v3 = vpop.eup %2619  ;;  %v430_v4 = vpack.c.bf16 %v2618_v2, %v2614_v63 }
 0x153   : > { %v429_v5 = vpack.c.bf16 %v2620_v3, %v2616_v1 }
 0x154   : > { %433 = vmatprep.subr.bf16.mxu1 %v430_v4 }
 0x155   : > { %434 = vmatpush1.bf16.msra.mxu1 %v429_v5 }
 0x158   : > { %2449 = vmatmul.mubr.msk.bf16.vlgmr.msra.gmra.mrb[4].mxu1 %vm294_vm0, %v3443_v17 }
 0x159   : > { %473 = vmatprep.mubr.bf16.mxu1 %v3237_v0 }
 0x160   : > { %2450 = vmatmul.mubr.msk.bf16.gmra.mrb[8].mxu1 %vm294_vm0, %v3445_v20 }
 0x161   : > { %593 = vmatprep.mubr.bf16.mxu1 %v3237_v0 }
 0x22b   : > { %v465_v6 = vpop.f32.mrb[4].mxu1 }
 0x22c   : > { %v466_v7 = vadd.f32 %v465_v6, %v3474_v36  ;;  %v467_v8 = vpop.f32.mrb[5].mxu1 }
 0x22d   : > { %v468_v9 = vadd.f32 %v467_v8, %v3476_v38  ;;  %v469_v10 = vpop.f32.mrb[6].mxu1 }
 0x22e   : > { %2621 = vtanh.f32 %v466_v7  ;;  %v470_v11 = vadd.f32 %v469_v10, %v3479_v41  ;;  %v471_v12 = vpop.f32.mrb[7].mxu1 }
 0x22f   : > { %2623 = vtanh.f32 %v468_v9  ;;  %v472_v13 = vadd.f32 %v471_v12, %v3481_v44 }
 0x230   : > { %2625 = vtanh.f32 %v470_v11 }
 0x231   : > { %2627 = vtanh.f32 %v472_v13 }
 0x233   : > { %v475_v14 = vpop.f32.mrb[8].mxu1 }
 0x234   : > { %v476_v15 = vadd.f32 %v475_v14, %v3486_v47  ;;  %v477_v16 = vpop.f32.mrb[9].mxu1 }
 0x235   : > { %v478_v18 = vadd.f32 %v477_v16, %v3488_v50  ;;  %v479_v19 = vpop.f32.mrb[10].mxu1 }
 0x236   : > { %2629 = vtanh.f32 %v476_v15  ;;  %v480_v21 = vadd.f32 %v479_v19, %v3490_v52  ;;  %v481_v22 = vpop.f32.mrb[11].mxu1 }
 0x237   : > { %2631 = vtanh.f32 %v478_v18  ;;  %v482_v23 = vadd.f32 %v481_v22, %v3493_v55 }
 0x238   : > { %v2622_v24 = vpop.eup %2621  ;;  %2633 = vtanh.f32 %v480_v21 }
 0x239   : > { %v2624_v25 = vpop.eup %2623  ;;  %2635 = vtanh.f32 %v482_v23 }
 0x23a   : > { %v2626_v26 = vpop.eup %2625 }
 0x23b   : > { %v2628_v27 = vpop.eup %2627  ;;  %v492_v28 = vpack.c.bf16 %v2626_v26, %v2622_v24 }
 0x23c   : > { %v493_v29 = vpack.c.bf16 %v2628_v27, %v2624_v25 }
 0x23e   : > { %496 = vmatprep.subr.bf16.mxu0 %v493_v29 }
 0x23f   : > { %497 = vmatpush1.bf16.msra.mxu0 %v492_v28 }
 0x240   : > { %v2630_v30 = vpop.eup %2629 }
 0x241   : > { %v2632_v31 = vpop.eup %2631 }
 0x242   : > { %v2634_v32 = vpop.eup %2633 }
 0x243   : > { %v2636_v33 = vpop.eup %2635  ;;  %v494_v34 = vpack.c.bf16 %v2634_v32, %v2630_v30 }
 0x244   : > { %v495_v35 = vpack.c.bf16 %v2636_v33, %v2632_v31 }
 0x246   : > { %498 = vmatprep.subr.bf16.mxu0 %v495_v35 }
 0x247   : > { %499 = vmatpush1.bf16.msra.mxu0 %v494_v34 }
 0x24a   : > { %2451 = vmatmul.mubr.msk.bf16.vlgmr.msra.gmra.mrb[8].mxu0 %vm294_vm0, %v3443_v17 }
 0x24b   : > { %538 = vmatprep.mubr.bf16.mxu0 %v3237_v0 }
 0x252   : > { %2452 = vmatmul.mubr.msk.bf16.gmra.mrb[12].mxu0 %vm294_vm0, %v3445_v20 }
 0x253   : > { %658 = vmatprep.mubr.bf16.mxu0 %v3237_v0 }
 0x31d   : > { %v530_v37 = vpop.f32.mrb[8].mxu0 }
 0x31e   : > { %v531_v39 = vadd.f32 %v530_v37, %v3474_v36  ;;  %v532_v40 = vpop.f32.mrb[9].mxu0 }
 0x31f   : > { %v533_v42 = vadd.f32 %v532_v40, %v3476_v38  ;;  %v534_v43 = vpop.f32.mrb[10].mxu0 }
 0x320   : > { %2637 = vtanh.f32 %v531_v39  ;;  %v535_v45 = vadd.f32 %v534_v43, %v3479_v41  ;;  %v536_v46 = vpop.f32.mrb[11].mxu0 }
 0x321   : > { %2639 = vtanh.f32 %v533_v42  ;;  %v537_v48 = vadd.f32 %v536_v46, %v3481_v44 }
 0x322   : > { %2641 = vtanh.f32 %v535_v45 }
 0x323   : > { %2643 = vtanh.f32 %v537_v48 }
 0x325   : > { %v540_v49 = vpop.f32.mrb[12].mxu0 }
 0x326   : > { %v541_v51 = vadd.f32 %v540_v49, %v3486_v47  ;;  %v542_v53 = vpop.f32.mrb[13].mxu0 }
 0x327   : > { %v543_v54 = vadd.f32 %v542_v53, %v3488_v50  ;;  %v544_v56 = vpop.f32.mrb[14].mxu0 }
 0x328   : > { %2645 = vtanh.f32 %v541_v51  ;;  %v545_v57 = vadd.f32 %v544_v56, %v3490_v52  ;;  %v546_v58 = vpop.f32.mrb[15].mxu0 }
 0x329   : > { %2647 = vtanh.f32 %v543_v54  ;;  %v547_v59 = vadd.f32 %v546_v58, %v3493_v55 }
 0x32a   : > { %v2638_v60 = vpop.eup %2637  ;;  %2649 = vtanh.f32 %v545_v57 }
 0x32b   : > { %v2640_v61 = vpop.eup %2639  ;;  %2651 = vtanh.f32 %v547_v59 }
 0x32c   : > { %v2642_v62 = vpop.eup %2641 }
 0x32d   : > { %v2644_v63 = vpop.eup %2643  ;;  %v557_v1 = vpack.c.bf16 %v2642_v62, %v2638_v60 }
 0x32e   : > { %v558_v2 = vpack.c.bf16 %v2644_v63, %v2640_v61 }
 0x330   : > { %561 = vmatprep.subr.bf16.mxu1 %v558_v2 }
 0x331   : > { %562 = vmatpush1.bf16.msra.mxu1 %v557_v1 }
 0x332   : > { %v2646_v3 = vpop.eup %2645 }
 0x333   : > { %v2648_v4 = vpop.eup %2647 }
 0x334   : > { %v2650_v5 = vpop.eup %2649 }
 0x335   : > { %v2652_v6 = vpop.eup %2651  ;;  %v559_v7 = vpack.c.bf16 %v2650_v5, %v2646_v3 }
 0x336   : > { %v560_v8 = vpack.c.bf16 %v2652_v6, %v2648_v4 }
 0x338   : > { %563 = vmatprep.subr.bf16.mxu1 %v560_v8 }
 0x339   : > { %564 = vmatpush1.bf16.msra.mxu1 %v559_v7 }
 0x33c   : > { %2453 = vmatmul.mubr.msk.bf16.vlgmr.msra.gmra.mrb[12].mxu1 %vm294_vm0, %v3443_v17 }
 0x33d   : > { %603 = vmatprep.mubr.bf16.mxu1 %v3237_v0 }
 0x344   : > { %2454 = vmatmul.mubr.msk.bf16.gmra.mrb[16].mxu1 %vm294_vm0, %v3445_v20 }
 0x345   : > { %723 = vmatprep.mubr.bf16.mxu1 %v3237_v0 }
 0x40f   : > { %v595_v9 = vpop.f32.mrb[12].mxu1 }
 0x410   : > { %v596_v10 = vadd.f32 %v595_v9, %v3474_v36  ;;  %v597_v11 = vpop.f32.mrb[13].mxu1 }
 0x411   : > { %v598_v12 = vadd.f32 %v597_v11, %v3476_v38  ;;  %v599_v13 = vpop.f32.mrb[14].mxu1 }
 0x412   : > { %2653 = vtanh.f32 %v596_v10  ;;  %v600_v14 = vadd.f32 %v599_v13, %v3479_v41  ;;  %v601_v15 = vpop.f32.mrb[15].mxu1 }
 0x413   : > { %2655 = vtanh.f32 %v598_v12  ;;  %v602_v16 = vadd.f32 %v601_v15, %v3481_v44 }
 0x414   : > { %2657 = vtanh.f32 %v600_v14 }
 0x415   : > { %2659 = vtanh.f32 %v602_v16 }
 0x417   : > { %v605_v18 = vpop.f32.mrb[16].mxu1 }
 0x418   : > { %v606_v19 = vadd.f32 %v605_v18, %v3486_v47  ;;  %v607_v21 = vpop.f32.mrb[17].mxu1 }
 0x419   : > { %v608_v22 = vadd.f32 %v607_v21, %v3488_v50  ;;  %v609_v23 = vpop.f32.mrb[18].mxu1 }
 0x41a   : > { %2661 = vtanh.f32 %v606_v19  ;;  %v610_v24 = vadd.f32 %v609_v23, %v3490_v52  ;;  %v611_v25 = vpop.f32.mrb[19].mxu1 }
 0x41b   : > { %2663 = vtanh.f32 %v608_v22  ;;  %v612_v26 = vadd.f32 %v611_v25, %v3493_v55 }
 0x41c   : > { %v2654_v27 = vpop.eup %2653  ;;  %2665 = vtanh.f32 %v610_v24 }
 0x41d   : > { %v2656_v28 = vpop.eup %2655  ;;  %2667 = vtanh.f32 %v612_v26 }
 0x41e   : > { %v2658_v29 = vpop.eup %2657 }
 0x41f   : > { %v2660_v30 = vpop.eup %2659  ;;  %v622_v31 = vpack.c.bf16 %v2658_v29, %v2654_v27 }
 0x420   : > { %v623_v32 = vpack.c.bf16 %v2660_v30, %v2656_v28 }
 0x422   : > { %626 = vmatprep.subr.bf16.mxu0 %v623_v32 }
 0x423   : > { %627 = vmatpush1.bf16.msra.mxu0 %v622_v31 }
 0x424   : > { %v2662_v33 = vpop.eup %2661 }
 0x425   : > { %v2664_v34 = vpop.eup %2663 }
 0x426   : > { %v2666_v35 = vpop.eup %2665 }
 0x427   : > { %v2668_v37 = vpop.eup %2667  ;;  %v624_v39 = vpack.c.bf16 %v2666_v35, %v2662_v33 }
 0x428   : > { %v625_v40 = vpack.c.bf16 %v2668_v37, %v2664_v34 }
 0x42a   : > { %628 = vmatprep.subr.bf16.mxu0 %v625_v40 }
 0x42b   : > { %629 = vmatpush1.bf16.msra.mxu0 %v624_v39 }
 0x42e   : > { %2455 = vmatmul.mubr.msk.bf16.vlgmr.msra.gmra.mrb[16].mxu0 %vm294_vm0, %v3443_v17 }
 0x42f   : > { %668 = vmatprep.mubr.bf16.mxu0 %v3237_v0 }
 0x436   : > { %2456 = vmatmul.mubr.msk.bf16.gmra.mrb[20].mxu0 %vm294_vm0, %v3445_v20 }
 0x437   : > { %788 = vmatprep.mubr.bf16.mxu0 %v3237_v0 }
 0x501   : > { %v660_v42 = vpop.f32.mrb[16].mxu0 }
 0x502   : > { %v661_v43 = vadd.f32 %v660_v42, %v3474_v36  ;;  %v662_v45 = vpop.f32.mrb[17].mxu0 }
 0x503   : > { %v663_v46 = vadd.f32 %v662_v45, %v3476_v38  ;;  %v664_v48 = vpop.f32.mrb[18].mxu0 }
 0x504   : > { %2669 = vtanh.f32 %v661_v43  ;;  %v665_v49 = vadd.f32 %v664_v48, %v3479_v41  ;;  %v666_v51 = vpop.f32.mrb[19].mxu0 }
 0x505   : > { %2671 = vtanh.f32 %v663_v46  ;;  %v667_v53 = vadd.f32 %v666_v51, %v3481_v44 }
 0x506   : > { %2673 = vtanh.f32 %v665_v49 }
 0x507   : > { %2675 = vtanh.f32 %v667_v53 }
 0x509   : > { %v670_v54 = vpop.f32.mrb[20].mxu0 }
 0x50a   : > { %v671_v56 = vadd.f32 %v670_v54, %v3486_v47  ;;  %v672_v57 = vpop.f32.mrb[21].mxu0 }
 0x50b   : > { %v673_v58 = vadd.f32 %v672_v57, %v3488_v50  ;;  %v674_v59 = vpop.f32.mrb[22].mxu0 }
 0x50c   : > { %2677 = vtanh.f32 %v671_v56  ;;  %v675_v60 = vadd.f32 %v674_v59, %v3490_v52  ;;  %v676_v61 = vpop.f32.mrb[23].mxu0 }
 0x50d   : > { %2679 = vtanh.f32 %v673_v58  ;;  %v677_v62 = vadd.f32 %v676_v61, %v3493_v55 }
 0x50e   : > { %v2670_v63 = vpop.eup %2669  ;;  %2681 = vtanh.f32 %v675_v60 }
 0x50f   : > { %v2672_v1 = vpop.eup %2671  ;;  %2683 = vtanh.f32 %v677_v62 }
 0x510   : > { %v2674_v2 = vpop.eup %2673 }
 0x511   : > { %v2676_v3 = vpop.eup %2675  ;;  %v687_v4 = vpack.c.bf16 %v2674_v2, %v2670_v63 }
 0x512   : > { %v688_v5 = vpack.c.bf16 %v2676_v3, %v2672_v1 }
 0x514   : > { %691 = vmatprep.subr.bf16.mxu1 %v688_v5 }
 0x515   : > { %692 = vmatpush1.bf16.msra.mxu1 %v687_v4 }
 0x516   : > { %v2678_v6 = vpop.eup %2677 }
 0x517   : > { %v2680_v7 = vpop.eup %2679 }
 0x518   : > { %v2682_v8 = vpop.eup %2681 }
 0x519   : > { %v2684_v9 = vpop.eup %2683  ;;  %v689_v10 = vpack.c.bf16 %v2682_v8, %v2678_v6 }
 0x51a   : > { %v690_v11 = vpack.c.bf16 %v2684_v9, %v2680_v7 }
 0x51c   : > { %693 = vmatprep.subr.bf16.mxu1 %v690_v11 }
 0x51d   : > { %694 = vmatpush1.bf16.msra.mxu1 %v689_v10 }
 0x520   : > { %2457 = vmatmul.mubr.msk.bf16.vlgmr.msra.gmra.mrb[20].mxu1 %vm294_vm0, %v3443_v17 }
 0x521   : > { %733 = vmatprep.mubr.bf16.mxu1 %v3237_v0 }
 0x528   : > { %2458 = vmatmul.mubr.msk.bf16.gmra.mrb[24].mxu1 %vm294_vm0, %v3445_v20 }
 0x529   : > { %853 = vmatprep.mubr.bf16.mxu1 %v3237_v0 }
 0x5f3   : > { %v725_v12 = vpop.f32.mrb[20].mxu1 }
 0x5f4   : > { %v726_v13 = vadd.f32 %v725_v12, %v3474_v36  ;;  %v727_v14 = vpop.f32.mrb[21].mxu1 }
 0x5f5   : > { %v728_v15 = vadd.f32 %v727_v14, %v3476_v38  ;;  %v729_v16 = vpop.f32.mrb[22].mxu1 }
 0x5f6   : > { %2685 = vtanh.f32 %v726_v13  ;;  %v730_v18 = vadd.f32 %v729_v16, %v3479_v41  ;;  %v731_v19 = vpop.f32.mrb[23].mxu1 }
 0x5f7   : > { %2687 = vtanh.f32 %v728_v15  ;;  %v732_v21 = vadd.f32 %v731_v19, %v3481_v44 }
 0x5f8   : > { %2689 = vtanh.f32 %v730_v18 }
 0x5f9   : > { %2691 = vtanh.f32 %v732_v21 }
 0x5fb   : > { %v735_v22 = vpop.f32.mrb[24].mxu1 }
 0x5fc   : > { %v736_v23 = vadd.f32 %v735_v22, %v3486_v47  ;;  %v737_v24 = vpop.f32.mrb[25].mxu1 }
 0x5fd   : > { %v738_v25 = vadd.f32 %v737_v24, %v3488_v50  ;;  %v739_v26 = vpop.f32.mrb[26].mxu1 }
 0x5fe   : > { %2693 = vtanh.f32 %v736_v23  ;;  %v740_v27 = vadd.f32 %v739_v26, %v3490_v52  ;;  %v741_v28 = vpop.f32.mrb[27].mxu1 }
 0x5ff   : > { %2695 = vtanh.f32 %v738_v25  ;;  %v742_v29 = vadd.f32 %v741_v28, %v3493_v55 }
 0x600   : > { %v2686_v30 = vpop.eup %2685  ;;  %2697 = vtanh.f32 %v740_v27 }
 0x601   : > { %v2688_v31 = vpop.eup %2687  ;;  %2699 = vtanh.f32 %v742_v29 }
 0x602   : > { %v2690_v32 = vpop.eup %2689 }
 0x603   : > { %v2692_v33 = vpop.eup %2691  ;;  %v752_v34 = vpack.c.bf16 %v2690_v32, %v2686_v30 }
 0x604   : > { %v753_v35 = vpack.c.bf16 %v2692_v33, %v2688_v31 }
 0x606   : > { %756 = vmatprep.subr.bf16.mxu0 %v753_v35 }
 0x607   : > { %757 = vmatpush1.bf16.msra.mxu0 %v752_v34 }
 0x608   : > { %v2694_v37 = vpop.eup %2693 }
 0x609   : > { %v2696_v39 = vpop.eup %2695 }
 0x60a   : > { %v2698_v40 = vpop.eup %2697 }
 0x60b   : > { %v2700_v42 = vpop.eup %2699  ;;  %v754_v43 = vpack.c.bf16 %v2698_v40, %v2694_v37 }
 0x60c   : > { %v755_v45 = vpack.c.bf16 %v2700_v42, %v2696_v39 }
 0x60e   : > { %758 = vmatprep.subr.bf16.mxu0 %v755_v45 }
 0x60f   : > { %759 = vmatpush1.bf16.msra.mxu0 %v754_v43 }
 0x612   : > { %2459 = vmatmul.mubr.msk.bf16.vlgmr.msra.gmra.mrb[24].mxu0 %vm294_vm0, %v3443_v17 }
 0x613   : > { %798 = vmatprep.mubr.bf16.mxu0 %v3237_v0 }
 0x61a   : > { %2460 = vmatmul.mubr.msk.bf16.gmra.mrb[28].mxu0 %vm294_vm0, %v3445_v20 }
 0x61b   : > { %918 = vmatprep.mubr.bf16.mxu0 %v3237_v0 }
 0x6e5   : > { %v790_v46 = vpop.f32.mrb[24].mxu0 }
 0x6e6   : > { %v791_v48 = vadd.f32 %v790_v46, %v3474_v36  ;;  %v792_v49 = vpop.f32.mrb[25].mxu0 }
 0x6e7   : > { %v793_v51 = vadd.f32 %v792_v49, %v3476_v38  ;;  %v794_v53 = vpop.f32.mrb[26].mxu0 }
 0x6e8   : > { %2701 = vtanh.f32 %v791_v48  ;;  %v795_v54 = vadd.f32 %v794_v53, %v3479_v41  ;;  %v796_v56 = vpop.f32.mrb[27].mxu0 }
 0x6e9   : > { %2703 = vtanh.f32 %v793_v51  ;;  %v797_v57 = vadd.f32 %v796_v56, %v3481_v44 }
 0x6ea   : > { %2705 = vtanh.f32 %v795_v54 }
 0x6eb   : > { %2707 = vtanh.f32 %v797_v57 }
 0x6ed   : > { %v800_v58 = vpop.f32.mrb[28].mxu0 }
 0x6ee   : > { %v801_v59 = vadd.f32 %v800_v58, %v3486_v47  ;;  %v802_v60 = vpop.f32.mrb[29].mxu0 }
 0x6ef   : > { %v803_v61 = vadd.f32 %v802_v60, %v3488_v50  ;;  %v804_v62 = vpop.f32.mrb[30].mxu0 }
 0x6f0   : > { %2709 = vtanh.f32 %v801_v59  ;;  %v805_v63 = vadd.f32 %v804_v62, %v3490_v52  ;;  %v806_v1 = vpop.f32.mrb[31].mxu0 }
 0x6f1   : > { %2711 = vtanh.f32 %v803_v61  ;;  %v807_v2 = vadd.f32 %v806_v1, %v3493_v55 }
 0x6f2   : > { %v2702_v3 = vpop.eup %2701  ;;  %2713 = vtanh.f32 %v805_v63 }
 0x6f3   : > { %v2704_v4 = vpop.eup %2703  ;;  %2715 = vtanh.f32 %v807_v2 }
 0x6f4   : > { %v2706_v5 = vpop.eup %2705 }
 0x6f5   : > { %v2708_v6 = vpop.eup %2707  ;;  %v817_v7 = vpack.c.bf16 %v2706_v5, %v2702_v3 }
 0x6f6   : > { %v818_v8 = vpack.c.bf16 %v2708_v6, %v2704_v4 }
 0x6f8   : > { %821 = vmatprep.subr.bf16.mxu1 %v818_v8 }
 0x6f9   : > { %822 = vmatpush1.bf16.msra.mxu1 %v817_v7 }
 0x6fa   : > { %v2710_v9 = vpop.eup %2709 }
 0x6fb   : > { %v2712_v10 = vpop.eup %2711 }
 0x6fc   : > { %v2714_v11 = vpop.eup %2713 }
 0x6fd   : > { %v2716_v12 = vpop.eup %2715  ;;  %v819_v13 = vpack.c.bf16 %v2714_v11, %v2710_v9 }
 0x6fe   : > { %v820_v14 = vpack.c.bf16 %v2716_v12, %v2712_v10 }
 0x700   : > { %823 = vmatprep.subr.bf16.mxu1 %v820_v14 }
 0x701   : > { %824 = vmatpush1.bf16.msra.mxu1 %v819_v13 }
 0x704   : > { %2461 = vmatmul.mubr.msk.bf16.vlgmr.msra.gmra.mrb[28].mxu1 %vm294_vm0, %v3443_v17 }
 0x705   : > { %863 = vmatprep.mubr.bf16.mxu1 %v3237_v0 }
 0x70c   : > { %2462 = vmatmul.mubr.msk.bf16.gmra.mrb[32].mxu1 %vm294_vm0, %v3445_v20 }
 0x70d   : > { %983 = vmatprep.mubr.bf16.mxu1 %v3237_v0 }
 0x7d7   : > { %v855_v15 = vpop.f32.mrb[28].mxu1 }
 0x7d8   : > { %v856_v16 = vadd.f32 %v855_v15, %v3474_v36  ;;  %v857_v18 = vpop.f32.mrb[29].mxu1 }
 0x7d9   : > { %v858_v19 = vadd.f32 %v857_v18, %v3476_v38  ;;  %v859_v21 = vpop.f32.mrb[30].mxu1 }
 0x7da   : > { %2717 = vtanh.f32 %v856_v16  ;;  %v860_v22 = vadd.f32 %v859_v21, %v3479_v41  ;;  %v861_v23 = vpop.f32.mrb[31].mxu1 }
 0x7db   : > { %2719 = vtanh.f32 %v858_v19  ;;  %v862_v24 = vadd.f32 %v861_v23, %v3481_v44 }
 0x7dc   : > { %2721 = vtanh.f32 %v860_v22 }
 0x7dd   : > { %2723 = vtanh.f32 %v862_v24 }
 0x7df   : > { %v865_v25 = vpop.f32.mrb[32].mxu1 }
 0x7e0   : > { %v866_v26 = vadd.f32 %v865_v25, %v3486_v47  ;;  %v867_v27 = vpop.f32.mrb[33].mxu1 }
 0x7e1   : > { %v868_v28 = vadd.f32 %v867_v27, %v3488_v50  ;;  %v869_v29 = vpop.f32.mrb[34].mxu1 }
 0x7e2   : > { %2725 = vtanh.f32 %v866_v26  ;;  %v870_v30 = vadd.f32 %v869_v29, %v3490_v52  ;;  %v871_v31 = vpop.f32.mrb[35].mxu1 }
 0x7e3   : > { %2727 = vtanh.f32 %v868_v28  ;;  %v872_v32 = vadd.f32 %v871_v31, %v3493_v55 }
 0x7e4   : > { %v2718_v33 = vpop.eup %2717  ;;  %2729 = vtanh.f32 %v870_v30 }
 0x7e5   : > { %v2720_v34 = vpop.eup %2719  ;;  %2731 = vtanh.f32 %v872_v32 }
 0x7e6   : > { %v2722_v35 = vpop.eup %2721 }
 0x7e7   : > { %v2724_v37 = vpop.eup %2723  ;;  %v882_v39 = vpack.c.bf16 %v2722_v35, %v2718_v33 }
 0x7e8   : > { %v883_v40 = vpack.c.bf16 %v2724_v37, %v2720_v34 }
 0x7ea   : > { %886 = vmatprep.subr.bf16.mxu0 %v883_v40 }
 0x7eb   : > { %887 = vmatpush1.bf16.msra.mxu0 %v882_v39 }
 0x7ec   : > { %v2726_v42 = vpop.eup %2725 }
 0x7ed   : > { %v2728_v43 = vpop.eup %2727 }
 0x7ee   : > { %v2730_v45 = vpop.eup %2729 }
 0x7ef   : > { %v2732_v46 = vpop.eup %2731  ;;  %v884_v48 = vpack.c.bf16 %v2730_v45, %v2726_v42 }
 0x7f0   : > { %v885_v49 = vpack.c.bf16 %v2732_v46, %v2728_v43 }
 0x7f2   : > { %888 = vmatprep.subr.bf16.mxu0 %v885_v49 }
 0x7f3   : > { %889 = vmatpush1.bf16.msra.mxu0 %v884_v48 }
 0x7f6   : > { %2463 = vmatmul.mubr.msk.bf16.vlgmr.msra.gmra.mrb[32].mxu0 %vm294_vm0, %v3443_v17 }
 0x7f7   : > { %928 = vmatprep.mubr.bf16.mxu0 %v3237_v0 }
 0x7fe   : > { %2464 = vmatmul.mubr.msk.bf16.gmra.mrb[36].mxu0 %vm294_vm0, %v3445_v20 }
 0x7ff   : > { %1048 = vmatprep.mubr.bf16.mxu0 %v3237_v0 }
 0x8c9   : > { %v920_v51 = vpop.f32.mrb[32].mxu0 }
 0x8ca   : > { %v921_v53 = vadd.f32 %v920_v51, %v3474_v36  ;;  %v922_v54 = vpop.f32.mrb[33].mxu0 }
 0x8cb   : > { %v923_v56 = vadd.f32 %v922_v54, %v3476_v38  ;;  %v924_v57 = vpop.f32.mrb[34].mxu0 }
 0x8cc   : > { %2733 = vtanh.f32 %v921_v53  ;;  %v925_v58 = vadd.f32 %v924_v57, %v3479_v41  ;;  %v926_v59 = vpop.f32.mrb[35].mxu0 }
 0x8cd   : > { %2735 = vtanh.f32 %v923_v56  ;;  %v927_v60 = vadd.f32 %v926_v59, %v3481_v44 }
 0x8ce   : > { %2737 = vtanh.f32 %v925_v58 }
 0x8cf   : > { %2739 = vtanh.f32 %v927_v60 }
 0x8d1   : > { %v930_v61 = vpop.f32.mrb[36].mxu0 }
 0x8d2   : > { %v931_v62 = vadd.f32 %v930_v61, %v3486_v47  ;;  %v932_v63 = vpop.f32.mrb[37].mxu0 }
 0x8d3   : > { %v933_v1 = vadd.f32 %v932_v63, %v3488_v50  ;;  %v934_v2 = vpop.f32.mrb[38].mxu0 }
 0x8d4   : > { %2741 = vtanh.f32 %v931_v62  ;;  %v935_v3 = vadd.f32 %v934_v2, %v3490_v52  ;;  %v936_v4 = vpop.f32.mrb[39].mxu0 }
 0x8d5   : > { %2743 = vtanh.f32 %v933_v1  ;;  %v937_v5 = vadd.f32 %v936_v4, %v3493_v55 }
 0x8d6   : > { %v2734_v6 = vpop.eup %2733  ;;  %2745 = vtanh.f32 %v935_v3 }
 0x8d7   : > { %v2736_v7 = vpop.eup %2735  ;;  %2747 = vtanh.f32 %v937_v5 }
 0x8d8   : > { %v2738_v8 = vpop.eup %2737 }
 0x8d9   : > { %v2740_v9 = vpop.eup %2739  ;;  %v947_v10 = vpack.c.bf16 %v2738_v8, %v2734_v6 }
 0x8da   : > { %v948_v11 = vpack.c.bf16 %v2740_v9, %v2736_v7 }
 0x8dc   : > { %951 = vmatprep.subr.bf16.mxu1 %v948_v11 }
 0x8dd   : > { %952 = vmatpush1.bf16.msra.mxu1 %v947_v10 }
 0x8de   : > { %v2742_v12 = vpop.eup %2741 }
 0x8df   : > { %v2744_v13 = vpop.eup %2743 }
 0x8e0   : > { %v2746_v14 = vpop.eup %2745 }
 0x8e1   : > { %v2748_v15 = vpop.eup %2747  ;;  %v949_v16 = vpack.c.bf16 %v2746_v14, %v2742_v12 }
 0x8e2   : > { %v950_v18 = vpack.c.bf16 %v2748_v15, %v2744_v13 }
 0x8e4   : > { %953 = vmatprep.subr.bf16.mxu1 %v950_v18 }
 0x8e5   : > { %954 = vmatpush1.bf16.msra.mxu1 %v949_v16 }
 0x8e8   : > { %2465 = vmatmul.mubr.msk.bf16.vlgmr.msra.gmra.mrb[36].mxu1 %vm294_vm0, %v3443_v17 }
 0x8e9   : > { %993 = vmatprep.mubr.bf16.mxu1 %v3237_v0 }
 0x8f0   : > { %2466 = vmatmul.mubr.msk.bf16.gmra.mrb[40].mxu1 %vm294_vm0, %v3445_v20 }
 0x8f1   : > { %1113 = vmatprep.mubr.bf16.mxu1 %v3237_v0 }
 0x9bb   : > { %v985_v19 = vpop.f32.mrb[36].mxu1 }
 0x9bc   : > { %v986_v21 = vadd.f32 %v985_v19, %v3474_v36  ;;  %v987_v22 = vpop.f32.mrb[37].mxu1 }
 0x9bd   : > { %v988_v23 = vadd.f32 %v987_v22, %v3476_v38  ;;  %v989_v24 = vpop.f32.mrb[38].mxu1 }
 0x9be   : > { %2749 = vtanh.f32 %v986_v21  ;;  %v990_v25 = vadd.f32 %v989_v24, %v3479_v41  ;;  %v991_v26 = vpop.f32.mrb[39].mxu1 }
 0x9bf   : > { %2751 = vtanh.f32 %v988_v23  ;;  %v992_v27 = vadd.f32 %v991_v26, %v3481_v44 }
 0x9c0   : > { %2753 = vtanh.f32 %v990_v25 }
 0x9c1   : > { %2755 = vtanh.f32 %v992_v27 }
 0x9c3   : > { %v995_v28 = vpop.f32.mrb[40].mxu1 }
 0x9c4   : > { %v996_v29 = vadd.f32 %v995_v28, %v3486_v47  ;;  %v997_v30 = vpop.f32.mrb[41].mxu1 }
 0x9c5   : > { %v998_v31 = vadd.f32 %v997_v30, %v3488_v50  ;;  %v999_v32 = vpop.f32.mrb[42].mxu1 }
 0x9c6   : > { %2757 = vtanh.f32 %v996_v29  ;;  %v1000_v33 = vadd.f32 %v999_v32, %v3490_v52  ;;  %v1001_v34 = vpop.f32.mrb[43].mxu1 }
 0x9c7   : > { %2759 = vtanh.f32 %v998_v31  ;;  %v1002_v35 = vadd.f32 %v1001_v34, %v3493_v55 }
 0x9c8   : > { %v2750_v37 = vpop.eup %2749  ;;  %2761 = vtanh.f32 %v1000_v33 }
 0x9c9   : > { %v2752_v39 = vpop.eup %2751  ;;  %2763 = vtanh.f32 %v1002_v35 }
 0x9ca   : > { %v2754_v40 = vpop.eup %2753 }
 0x9cb   : > { %v2756_v42 = vpop.eup %2755  ;;  %v1012_v43 = vpack.c.bf16 %v2754_v40, %v2750_v37 }
 0x9cc   : > { %v1013_v45 = vpack.c.bf16 %v2756_v42, %v2752_v39 }
 0x9ce   : > { %1016 = vmatprep.subr.bf16.mxu0 %v1013_v45 }
 0x9cf   : > { %1017 = vmatpush1.bf16.msra.mxu0 %v1012_v43 }
 0x9d0   : > { %v2758_v46 = vpop.eup %2757 }
 0x9d1   : > { %v2760_v48 = vpop.eup %2759 }
 0x9d2   : > { %v2762_v49 = vpop.eup %2761 }
 0x9d3   : > { %v2764_v51 = vpop.eup %2763  ;;  %v1014_v53 = vpack.c.bf16 %v2762_v49, %v2758_v46 }
 0x9d4   : > { %v1015_v54 = vpack.c.bf16 %v2764_v51, %v2760_v48 }
 0x9d6   : > { %1018 = vmatprep.subr.bf16.mxu0 %v1015_v54 }
 0x9d7   : > { %1019 = vmatpush1.bf16.msra.mxu0 %v1014_v53 }
 0x9da   : > { %2467 = vmatmul.mubr.msk.bf16.vlgmr.msra.gmra.mrb[40].mxu0 %vm294_vm0, %v3443_v17 }
 0x9db   : > { %1058 = vmatprep.mubr.bf16.mxu0 %v3237_v0 }
 0x9e2   : > { %2468 = vmatmul.mubr.msk.bf16.gmra.mrb[44].mxu0 %vm294_vm0, %v3445_v20 }
 0x9e3   : > { %1178 = vmatprep.mubr.bf16.mxu0 %v3237_v0 }
 0xaad   : > { %v1050_v56 = vpop.f32.mrb[40].mxu0 }
 0xaae   : > { %v1051_v57 = vadd.f32 %v1050_v56, %v3474_v36  ;;  %v1052_v58 = vpop.f32.mrb[41].mxu0 }
 0xaaf   : > { %v1053_v59 = vadd.f32 %v1052_v58, %v3476_v38  ;;  %v1054_v60 = vpop.f32.mrb[42].mxu0 }
 0xab0   : > { %2765 = vtanh.f32 %v1051_v57  ;;  %v1055_v61 = vadd.f32 %v1054_v60, %v3479_v41  ;;  %v1056_v62 = vpop.f32.mrb[43].mxu0 }
 0xab1   : > { %2767 = vtanh.f32 %v1053_v59  ;;  %v1057_v63 = vadd.f32 %v1056_v62, %v3481_v44 }
 0xab2   : > { %2769 = vtanh.f32 %v1055_v61 }
 0xab3   : > { %2771 = vtanh.f32 %v1057_v63 }
 0xab5   : > { %v1060_v1 = vpop.f32.mrb[44].mxu0 }
 0xab6   : > { %v1061_v2 = vadd.f32 %v1060_v1, %v3486_v47  ;;  %v1062_v3 = vpop.f32.mrb[45].mxu0 }
 0xab7   : > { %v1063_v4 = vadd.f32 %v1062_v3, %v3488_v50  ;;  %v1064_v5 = vpop.f32.mrb[46].mxu0 }
 0xab8   : > { %2773 = vtanh.f32 %v1061_v2  ;;  %v1065_v6 = vadd.f32 %v1064_v5, %v3490_v52  ;;  %v1066_v7 = vpop.f32.mrb[47].mxu0 }
 0xab9   : > { %2775 = vtanh.f32 %v1063_v4  ;;  %v1067_v8 = vadd.f32 %v1066_v7, %v3493_v55 }
 0xaba   : > { %v2766_v9 = vpop.eup %2765  ;;  %2777 = vtanh.f32 %v1065_v6 }
 0xabb   : > { %v2768_v10 = vpop.eup %2767  ;;  %2779 = vtanh.f32 %v1067_v8 }
 0xabc   : > { %v2770_v11 = vpop.eup %2769 }
 0xabd   : > { %v2772_v12 = vpop.eup %2771  ;;  %v1077_v13 = vpack.c.bf16 %v2770_v11, %v2766_v9 }
 0xabe   : > { %v1078_v14 = vpack.c.bf16 %v2772_v12, %v2768_v10 }
 0xac0   : > { %1081 = vmatprep.subr.bf16.mxu1 %v1078_v14 }
 0xac1   : > { %1082 = vmatpush1.bf16.msra.mxu1 %v1077_v13 }
 0xac2   : > { %v2774_v15 = vpop.eup %2773 }
 0xac3   : > { %v2776_v16 = vpop.eup %2775 }
 0xac4   : > { %v2778_v18 = vpop.eup %2777 }
 0xac5   : > { %v2780_v19 = vpop.eup %2779  ;;  %v1079_v21 = vpack.c.bf16 %v2778_v18, %v2774_v15 }
 0xac6   : > { %v1080_v22 = vpack.c.bf16 %v2780_v19, %v2776_v16 }
 0xac8   : > { %1083 = vmatprep.subr.bf16.mxu1 %v1080_v22 }
 0xac9   : > { %1084 = vmatpush1.bf16.msra.mxu1 %v1079_v21 }
 0xacc   : > { %2469 = vmatmul.mubr.msk.bf16.vlgmr.msra.gmra.mrb[44].mxu1 %vm294_vm0, %v3443_v17 }
 0xacd   : > { %1123 = vmatprep.mubr.bf16.mxu1 %v3237_v0 }
 0xad4   : > { %2470 = vmatmul.mubr.msk.bf16.gmra.mrb[48].mxu1 %vm294_vm0, %v3445_v20 }
 0xad5   : > { %1243 = vmatprep.mubr.bf16.mxu1 %v3237_v0 }
 0xb9f   : > { %v1115_v23 = vpop.f32.mrb[44].mxu1 }
 0xba0   : > { %v1116_v24 = vadd.f32 %v1115_v23, %v3474_v36  ;;  %v1117_v25 = vpop.f32.mrb[45].mxu1 }
 0xba1   : > { %v1118_v26 = vadd.f32 %v1117_v25, %v3476_v38  ;;  %v1119_v27 = vpop.f32.mrb[46].mxu1 }
 0xba2   : > { %2781 = vtanh.f32 %v1116_v24  ;;  %v1120_v28 = vadd.f32 %v1119_v27, %v3479_v41  ;;  %v1121_v29 = vpop.f32.mrb[47].mxu1 }
 0xba3   : > { %2783 = vtanh.f32 %v1118_v26  ;;  %v1122_v30 = vadd.f32 %v1121_v29, %v3481_v44 }
 0xba4   : > { %2785 = vtanh.f32 %v1120_v28 }
 0xba5   : > { %2787 = vtanh.f32 %v1122_v30 }
 0xba7   : > { %v1125_v31 = vpop.f32.mrb[48].mxu1 }
 0xba8   : > { %v1126_v32 = vadd.f32 %v1125_v31, %v3486_v47  ;;  %v1127_v33 = vpop.f32.mrb[49].mxu1 }
 0xba9   : > { %v1128_v34 = vadd.f32 %v1127_v33, %v3488_v50  ;;  %v1129_v35 = vpop.f32.mrb[50].mxu1 }
 0xbaa   : > { %2789 = vtanh.f32 %v1126_v32  ;;  %v1130_v37 = vadd.f32 %v1129_v35, %v3490_v52  ;;  %v1131_v39 = vpop.f32.mrb[51].mxu1 }
 0xbab   : > { %2791 = vtanh.f32 %v1128_v34  ;;  %v1132_v40 = vadd.f32 %v1131_v39, %v3493_v55 }
 0xbac   : > { %v2782_v42 = vpop.eup %2781  ;;  %2793 = vtanh.f32 %v1130_v37 }
 0xbad   : > { %v2784_v43 = vpop.eup %2783  ;;  %2795 = vtanh.f32 %v1132_v40 }
 0xbae   : > { %v2786_v45 = vpop.eup %2785 }
 0xbaf   : > { %v2788_v46 = vpop.eup %2787  ;;  %v1142_v48 = vpack.c.bf16 %v2786_v45, %v2782_v42 }
 0xbb0   : > { %v1143_v49 = vpack.c.bf16 %v2788_v46, %v2784_v43 }
 0xbb2   : > { %1146 = vmatprep.subr.bf16.mxu0 %v1143_v49 }
 0xbb3   : > { %1147 = vmatpush1.bf16.msra.mxu0 %v1142_v48 }
 0xbb4   : > { %v2790_v51 = vpop.eup %2789 }
 0xbb5   : > { %v2792_v53 = vpop.eup %2791 }
 0xbb6   : > { %v2794_v54 = vpop.eup %2793 }
 0xbb7   : > { %v2796_v56 = vpop.eup %2795  ;;  %v1144_v57 = vpack.c.bf16 %v2794_v54, %v2790_v51 }
 0xbb8   : > { %v1145_v58 = vpack.c.bf16 %v2796_v56, %v2792_v53 }
 0xbba   : > { %1148 = vmatprep.subr.bf16.mxu0 %v1145_v58 }
 0xbbb   : > { %1149 = vmatpush1.bf16.msra.mxu0 %v1144_v57 }
 0xbbe   : > { %2471 = vmatmul.mubr.msk.bf16.vlgmr.msra.gmra.mrb[48].mxu0 %vm294_vm0, %v3443_v17 }
 0xbbf   : > { %1188 = vmatprep.mubr.bf16.mxu0 %v3237_v0 }
 0xbc6   : > { %2472 = vmatmul.mubr.msk.bf16.gmra.mrb[52].mxu0 %vm294_vm0, %v3445_v20 }
 0xbc7   : > { %1308 = vmatprep.mubr.bf16.mxu0 %v3237_v0 }
 0xc91   : > { %v1180_v59 = vpop.f32.mrb[48].mxu0 }
 0xc92   : > { %v1181_v60 = vadd.f32 %v1180_v59, %v3474_v36  ;;  %v1182_v61 = vpop.f32.mrb[49].mxu0 }
 0xc93   : > { %v1183_v62 = vadd.f32 %v1182_v61, %v3476_v38  ;;  %v1184_v63 = vpop.f32.mrb[50].mxu0 }
 0xc94   : > { %2797 = vtanh.f32 %v1181_v60  ;;  %v1185_v1 = vadd.f32 %v1184_v63, %v3479_v41  ;;  %v1186_v2 = vpop.f32.mrb[51].mxu0 }
 0xc95   : > { %2799 = vtanh.f32 %v1183_v62  ;;  %v1187_v3 = vadd.f32 %v1186_v2, %v3481_v44 }
 0xc96   : > { %2801 = vtanh.f32 %v1185_v1 }
 0xc97   : > { %2803 = vtanh.f32 %v1187_v3 }
 0xc99   : > { %v1190_v4 = vpop.f32.mrb[52].mxu0 }
 0xc9a   : > { %v1191_v5 = vadd.f32 %v1190_v4, %v3486_v47  ;;  %v1192_v6 = vpop.f32.mrb[53].mxu0 }
 0xc9b   : > { %v1193_v7 = vadd.f32 %v1192_v6, %v3488_v50  ;;  %v1194_v8 = vpop.f32.mrb[54].mxu0 }
 0xc9c   : > { %2805 = vtanh.f32 %v1191_v5  ;;  %v1195_v9 = vadd.f32 %v1194_v8, %v3490_v52  ;;  %v1196_v10 = vpop.f32.mrb[55].mxu0 }
 0xc9d   : > { %2807 = vtanh.f32 %v1193_v7  ;;  %v1197_v11 = vadd.f32 %v1196_v10, %v3493_v55 }
 0xc9e   : > { %v2798_v12 = vpop.eup %2797  ;;  %2809 = vtanh.f32 %v1195_v9 }
 0xc9f   : > { %v2800_v13 = vpop.eup %2799  ;;  %2811 = vtanh.f32 %v1197_v11 }
 0xca0   : > { %v2802_v14 = vpop.eup %2801 }
 0xca1   : > { %v2804_v15 = vpop.eup %2803  ;;  %v1207_v16 = vpack.c.bf16 %v2802_v14, %v2798_v12 }
 0xca2   : > { %v1208_v18 = vpack.c.bf16 %v2804_v15, %v2800_v13 }
 0xca4   : > { %1211 = vmatprep.subr.bf16.mxu1 %v1208_v18 }
 0xca5   : > { %1212 = vmatpush1.bf16.msra.mxu1 %v1207_v16 }
 0xca6   : > { %v2806_v19 = vpop.eup %2805 }
 0xca7   : > { %v2808_v21 = vpop.eup %2807 }
 0xca8   : > { %v2810_v22 = vpop.eup %2809 }
 0xca9   : > { %v2812_v23 = vpop.eup %2811  ;;  %v1209_v24 = vpack.c.bf16 %v2810_v22, %v2806_v19 }
 0xcaa   : > { %v1210_v25 = vpack.c.bf16 %v2812_v23, %v2808_v21 }
 0xcac   : > { %1213 = vmatprep.subr.bf16.mxu1 %v1210_v25 }
 0xcad   : > { %1214 = vmatpush1.bf16.msra.mxu1 %v1209_v24 }
 0xcb0   : > { %2473 = vmatmul.mubr.msk.bf16.vlgmr.msra.gmra.mrb[52].mxu1 %vm294_vm0, %v3443_v17 }
 0xcb1   : > { %1253 = vmatprep.mubr.bf16.mxu1 %v3237_v0 }
 0xcb8   : > { %2474 = vmatmul.mubr.msk.bf16.gmra.mrb[56].mxu1 %vm294_vm0, %v3445_v20 }
 0xcb9   : > { %1373 = vmatprep.mubr.bf16.mxu1 %v3237_v0 }
 0xd83   : > { %v1245_v26 = vpop.f32.mrb[52].mxu1 }
 0xd84   : > { %v1246_v27 = vadd.f32 %v1245_v26, %v3474_v36  ;;  %v1247_v28 = vpop.f32.mrb[53].mxu1 }
 0xd85   : > { %v1248_v29 = vadd.f32 %v1247_v28, %v3476_v38  ;;  %v1249_v30 = vpop.f32.mrb[54].mxu1 }
 0xd86   : > { %2813 = vtanh.f32 %v1246_v27  ;;  %v1250_v31 = vadd.f32 %v1249_v30, %v3479_v41  ;;  %v1251_v32 = vpop.f32.mrb[55].mxu1 }
 0xd87   : > { %2815 = vtanh.f32 %v1248_v29  ;;  %v1252_v33 = vadd.f32 %v1251_v32, %v3481_v44 }
 0xd88   : > { %2817 = vtanh.f32 %v1250_v31 }
 0xd89   : > { %2819 = vtanh.f32 %v1252_v33 }
 0xd8b   : > { %v1255_v34 = vpop.f32.mrb[56].mxu1 }
 0xd8c   : > { %v1256_v35 = vadd.f32 %v1255_v34, %v3486_v47  ;;  %v1257_v37 = vpop.f32.mrb[57].mxu1 }
 0xd8d   : > { %v1258_v39 = vadd.f32 %v1257_v37, %v3488_v50  ;;  %v1259_v40 = vpop.f32.mrb[58].mxu1 }
 0xd8e   : > { %2821 = vtanh.f32 %v1256_v35  ;;  %v1260_v42 = vadd.f32 %v1259_v40, %v3490_v52  ;;  %v1261_v43 = vpop.f32.mrb[59].mxu1 }
 0xd8f   : > { %2823 = vtanh.f32 %v1258_v39  ;;  %v1262_v45 = vadd.f32 %v1261_v43, %v3493_v55 }
 0xd90   : > { %v2814_v46 = vpop.eup %2813  ;;  %2825 = vtanh.f32 %v1260_v42 }
 0xd91   : > { %v2816_v48 = vpop.eup %2815  ;;  %2827 = vtanh.f32 %v1262_v45 }
 0xd92   : > { %v2818_v49 = vpop.eup %2817 }
 0xd93   : > { %v2820_v51 = vpop.eup %2819  ;;  %v1272_v53 = vpack.c.bf16 %v2818_v49, %v2814_v46 }
 0xd94   : > { %v1273_v54 = vpack.c.bf16 %v2820_v51, %v2816_v48 }
 0xd96   : > { %1276 = vmatprep.subr.bf16.mxu0 %v1273_v54 }
 0xd97   : > { %1277 = vmatpush1.bf16.msra.mxu0 %v1272_v53 }
 0xd98   : > { %v2822_v56 = vpop.eup %2821 }
 0xd99   : > { %v2824_v57 = vpop.eup %2823 }
 0xd9a   : > { %v2826_v58 = vpop.eup %2825 }
 0xd9b   : > { %v2828_v59 = vpop.eup %2827  ;;  %v1274_v60 = vpack.c.bf16 %v2826_v58, %v2822_v56 }
 0xd9c   : > { %v1275_v61 = vpack.c.bf16 %v2828_v59, %v2824_v57 }
 0xd9e   : > { %1278 = vmatprep.subr.bf16.mxu0 %v1275_v61 }
 0xd9f   : > { %1279 = vmatpush1.bf16.msra.mxu0 %v1274_v60 }
 0xda2   : > { %2475 = vmatmul.mubr.msk.bf16.vlgmr.msra.gmra.mrb[56].mxu0 %vm294_vm0, %v3443_v17 }
 0xda3   : > { %1318 = vmatprep.mubr.bf16.mxu0 %v3237_v0 }
 0xdaa   : > { %2476 = vmatmul.mubr.msk.bf16.gmra.mrb[60].mxu0 %vm294_vm0, %v3445_v20 }
 0xdab   : > { %1438 = vmatprep.mubr.bf16.mxu0 %v3237_v0 }
 0xe75   : > { %v1310_v62 = vpop.f32.mrb[56].mxu0 }
 0xe76   : > { %v1311_v63 = vadd.f32 %v1310_v62, %v3474_v36  ;;  %v1312_v1 = vpop.f32.mrb[57].mxu0 }
 0xe77   : > { %v1313_v2 = vadd.f32 %v1312_v1, %v3476_v38  ;;  %v1314_v3 = vpop.f32.mrb[58].mxu0 }
 0xe78   : > { %2829 = vtanh.f32 %v1311_v63  ;;  %v1315_v4 = vadd.f32 %v1314_v3, %v3479_v41  ;;  %v1316_v5 = vpop.f32.mrb[59].mxu0 }
 0xe79   : > { %2831 = vtanh.f32 %v1313_v2  ;;  %v1317_v6 = vadd.f32 %v1316_v5, %v3481_v44 }
 0xe7a   : > { %2833 = vtanh.f32 %v1315_v4 }
 0xe7b   : > { %2835 = vtanh.f32 %v1317_v6 }
 0xe7d   : > { %v1320_v7 = vpop.f32.mrb[60].mxu0 }
 0xe7e   : > { %v1321_v8 = vadd.f32 %v1320_v7, %v3486_v47  ;;  %v1322_v9 = vpop.f32.mrb[61].mxu0 }
 0xe7f   : > { %v1323_v10 = vadd.f32 %v1322_v9, %v3488_v50  ;;  %v1324_v11 = vpop.f32.mrb[62].mxu0 }
 0xe80   : > { %2837 = vtanh.f32 %v1321_v8  ;;  %v1325_v12 = vadd.f32 %v1324_v11, %v3490_v52  ;;  %v1326_v13 = vpop.f32.mrb[63].mxu0 }
 0xe81   : > { %2839 = vtanh.f32 %v1323_v10  ;;  %v1327_v14 = vadd.f32 %v1326_v13, %v3493_v55 }
 0xe82   : > { %v2830_v15 = vpop.eup %2829  ;;  %2841 = vtanh.f32 %v1325_v12 }
 0xe83   : > { %v2832_v16 = vpop.eup %2831  ;;  %2843 = vtanh.f32 %v1327_v14 }
 0xe84   : > { %v2834_v18 = vpop.eup %2833 }
 0xe85   : > { %v2836_v19 = vpop.eup %2835  ;;  %v1337_v21 = vpack.c.bf16 %v2834_v18, %v2830_v15 }
 0xe86   : > { %v1338_v22 = vpack.c.bf16 %v2836_v19, %v2832_v16 }
 0xe88   : > { %1341 = vmatprep.subr.bf16.mxu1 %v1338_v22 }
 0xe89   : > { %1342 = vmatpush1.bf16.msra.mxu1 %v1337_v21 }
 0xe8a   : > { %v2838_v23 = vpop.eup %2837 }
 0xe8b   : > { %v2840_v24 = vpop.eup %2839 }
 0xe8c   : > { %v2842_v25 = vpop.eup %2841 }
 0xe8d   : > { %v2844_v26 = vpop.eup %2843  ;;  %v1339_v27 = vpack.c.bf16 %v2842_v25, %v2838_v23 }
 0xe8e   : > { %v1340_v28 = vpack.c.bf16 %v2844_v26, %v2840_v24 }
 0xe90   : > { %1343 = vmatprep.subr.bf16.mxu1 %v1340_v28 }
 0xe91   : > { %1344 = vmatpush1.bf16.msra.mxu1 %v1339_v27 }
 0xe94   : > { %2477 = vmatmul.mubr.msk.bf16.vlgmr.msra.gmra.mrb[60].mxu1 %vm294_vm0, %v3443_v17 }
 0xe95   : > { %1383 = vmatprep.mubr.bf16.mxu1 %v3237_v0 }
 0xe9c   : > { %2478 = vmatmul.mubr.msk.bf16.gmra.mrb[64].mxu1 %vm294_vm0, %v3445_v20 }
 0xe9d   : > { %1503 = vmatprep.mubr.bf16.mxu1 %v3237_v0 }
 0xf67   : > { %v1375_v29 = vpop.f32.mrb[60].mxu1 }
 0xf68   : > { %v1376_v30 = vadd.f32 %v1375_v29, %v3474_v36  ;;  %v1377_v31 = vpop.f32.mrb[61].mxu1 }
 0xf69   : > { %v1378_v32 = vadd.f32 %v1377_v31, %v3476_v38  ;;  %v1379_v33 = vpop.f32.mrb[62].mxu1 }
 0xf6a   : > { %2845 = vtanh.f32 %v1376_v30  ;;  %v1380_v34 = vadd.f32 %v1379_v33, %v3479_v41  ;;  %v1381_v35 = vpop.f32.mrb[63].mxu1 }
 0xf6b   : > { %2847 = vtanh.f32 %v1378_v32  ;;  %v1382_v37 = vadd.f32 %v1381_v35, %v3481_v44 }
 0xf6c   : > { %2849 = vtanh.f32 %v1380_v34 }
 0xf6d   : > { %2851 = vtanh.f32 %v1382_v37 }
 0xf6f   : > { %v1385_v39 = vpop.f32.mrb[64].mxu1 }
 0xf70   : > { %v1386_v40 = vadd.f32 %v1385_v39, %v3486_v47  ;;  %v1387_v42 = vpop.f32.mrb[65].mxu1 }
 0xf71   : > { %v1388_v43 = vadd.f32 %v1387_v42, %v3488_v50  ;;  %v1389_v45 = vpop.f32.mrb[66].mxu1 }
 0xf72   : > { %2853 = vtanh.f32 %v1386_v40  ;;  %v1390_v46 = vadd.f32 %v1389_v45, %v3490_v52  ;;  %v1391_v48 = vpop.f32.mrb[67].mxu1 }
 0xf73   : > { %2855 = vtanh.f32 %v1388_v43  ;;  %v1392_v49 = vadd.f32 %v1391_v48, %v3493_v55 }
 0xf74   : > { %v2846_v51 = vpop.eup %2845  ;;  %2857 = vtanh.f32 %v1390_v46 }
 0xf75   : > { %v2848_v53 = vpop.eup %2847  ;;  %2859 = vtanh.f32 %v1392_v49 }
 0xf76   : > { %v2850_v54 = vpop.eup %2849 }
 0xf77   : > { %v2852_v56 = vpop.eup %2851  ;;  %v1402_v57 = vpack.c.bf16 %v2850_v54, %v2846_v51 }
 0xf78   : > { %v1403_v58 = vpack.c.bf16 %v2852_v56, %v2848_v53 }
 0xf7a   : > { %1406 = vmatprep.subr.bf16.mxu0 %v1403_v58 }
 0xf7b   : > { %1407 = vmatpush1.bf16.msra.mxu0 %v1402_v57 }
 0xf7c   : > { %v2854_v59 = vpop.eup %2853 }
 0xf7d   : > { %v2856_v60 = vpop.eup %2855 }
 0xf7e   : > { %v2858_v61 = vpop.eup %2857 }
 0xf7f   : > { %v2860_v62 = vpop.eup %2859  ;;  %v1404_v63 = vpack.c.bf16 %v2858_v61, %v2854_v59 }
 0xf80   : > { %v1405_v1 = vpack.c.bf16 %v2860_v62, %v2856_v60 }
 0xf82   : > { %1408 = vmatprep.subr.bf16.mxu0 %v1405_v1 }
 0xf83   : > { %1409 = vmatpush1.bf16.msra.mxu0 %v1404_v63 }
 0xf86   : > { %2479 = vmatmul.mubr.msk.bf16.vlgmr.msra.gmra.mrb[64].mxu0 %vm294_vm0, %v3443_v17 }
 0xf87   : > { %1448 = vmatprep.mubr.bf16.mxu0 %v3237_v0 }
 0xf8e   : > { %2480 = vmatmul.mubr.msk.bf16.gmra.mrb[68].mxu0 %vm294_vm0, %v3445_v20 }
 0xf8f   : > { %1568 = vmatprep.mubr.bf16.mxu0 %v3237_v0 }
0x1059   : > { %v1440_v2 = vpop.f32.mrb[64].mxu0 }
0x105a   : > { %v1441_v3 = vadd.f32 %v1440_v2, %v3474_v36  ;;  %v1442_v4 = vpop.f32.mrb[65].mxu0 }
0x105b   : > { %v1443_v5 = vadd.f32 %v1442_v4, %v3476_v38  ;;  %v1444_v6 = vpop.f32.mrb[66].mxu0 }
0x105c   : > { %2861 = vtanh.f32 %v1441_v3  ;;  %v1445_v7 = vadd.f32 %v1444_v6, %v3479_v41  ;;  %v1446_v8 = vpop.f32.mrb[67].mxu0 }
0x105d   : > { %2863 = vtanh.f32 %v1443_v5  ;;  %v1447_v9 = vadd.f32 %v1446_v8, %v3481_v44 }
0x105e   : > { %2865 = vtanh.f32 %v1445_v7 }
0x105f   : > { %2867 = vtanh.f32 %v1447_v9 }
0x1061   : > { %v1450_v10 = vpop.f32.mrb[68].mxu0 }
0x1062   : > { %v1451_v11 = vadd.f32 %v1450_v10, %v3486_v47  ;;  %v1452_v12 = vpop.f32.mrb[69].mxu0 }
0x1063   : > { %v1453_v13 = vadd.f32 %v1452_v12, %v3488_v50  ;;  %v1454_v14 = vpop.f32.mrb[70].mxu0 }
0x1064   : > { %2869 = vtanh.f32 %v1451_v11  ;;  %v1455_v15 = vadd.f32 %v1454_v14, %v3490_v52  ;;  %v1456_v16 = vpop.f32.mrb[71].mxu0 }
0x1065   : > { %2871 = vtanh.f32 %v1453_v13  ;;  %v1457_v18 = vadd.f32 %v1456_v16, %v3493_v55 }
0x1066   : > { %v2862_v19 = vpop.eup %2861  ;;  %2873 = vtanh.f32 %v1455_v15 }
0x1067   : > { %v2864_v21 = vpop.eup %2863  ;;  %2875 = vtanh.f32 %v1457_v18 }
0x1068   : > { %v2866_v22 = vpop.eup %2865 }
0x1069   : > { %v2868_v23 = vpop.eup %2867  ;;  %v1467_v24 = vpack.c.bf16 %v2866_v22, %v2862_v19 }
0x106a   : > { %v1468_v25 = vpack.c.bf16 %v2868_v23, %v2864_v21 }
0x106c   : > { %1471 = vmatprep.subr.bf16.mxu1 %v1468_v25 }
0x106d   : > { %1472 = vmatpush1.bf16.msra.mxu1 %v1467_v24 }
0x106e   : > { %v2870_v26 = vpop.eup %2869 }
0x106f   : > { %v2872_v27 = vpop.eup %2871 }
0x1070   : > { %v2874_v28 = vpop.eup %2873 }
0x1071   : > { %v2876_v29 = vpop.eup %2875  ;;  %v1469_v30 = vpack.c.bf16 %v2874_v28, %v2870_v26 }
0x1072   : > { %v1470_v31 = vpack.c.bf16 %v2876_v29, %v2872_v27 }
0x1074   : > { %1473 = vmatprep.subr.bf16.mxu1 %v1470_v31 }
0x1075   : > { %1474 = vmatpush1.bf16.msra.mxu1 %v1469_v30 }
0x1078   : > { %2481 = vmatmul.mubr.msk.bf16.vlgmr.msra.gmra.mrb[68].mxu1 %vm294_vm0, %v3443_v17 }
0x1079   : > { %1513 = vmatprep.mubr.bf16.mxu1 %v3237_v0 }
0x1080   : > { %2482 = vmatmul.mubr.msk.bf16.gmra.mrb[72].mxu1 %vm294_vm0, %v3445_v20 }
0x1081   : > { %1633 = vmatprep.mubr.bf16.mxu1 %v3237_v0 }
0x114b   : > { %v1505_v32 = vpop.f32.mrb[68].mxu1 }
0x114c   : > { %v1506_v33 = vadd.f32 %v1505_v32, %v3474_v36  ;;  %v1507_v34 = vpop.f32.mrb[69].mxu1 }
0x114d   : > { %v1508_v35 = vadd.f32 %v1507_v34, %v3476_v38  ;;  %v1509_v37 = vpop.f32.mrb[70].mxu1 }
0x114e   : > { %2877 = vtanh.f32 %v1506_v33  ;;  %v1510_v39 = vadd.f32 %v1509_v37, %v3479_v41  ;;  %v1511_v40 = vpop.f32.mrb[71].mxu1 }
0x114f   : > { %2879 = vtanh.f32 %v1508_v35  ;;  %v1512_v42 = vadd.f32 %v1511_v40, %v3481_v44 }
0x1150   : > { %2881 = vtanh.f32 %v1510_v39 }
0x1151   : > { %2883 = vtanh.f32 %v1512_v42 }
0x1153   : > { %v1515_v43 = vpop.f32.mrb[72].mxu1 }
0x1154   : > { %v1516_v45 = vadd.f32 %v1515_v43, %v3486_v47  ;;  %v1517_v46 = vpop.f32.mrb[73].mxu1 }
0x1155   : > { %v1518_v48 = vadd.f32 %v1517_v46, %v3488_v50  ;;  %v1519_v49 = vpop.f32.mrb[74].mxu1 }
0x1156   : > { %2885 = vtanh.f32 %v1516_v45  ;;  %v1520_v51 = vadd.f32 %v1519_v49, %v3490_v52  ;;  %v1521_v53 = vpop.f32.mrb[75].mxu1 }
0x1157   : > { %2887 = vtanh.f32 %v1518_v48  ;;  %v1522_v54 = vadd.f32 %v1521_v53, %v3493_v55 }
0x1158   : > { %v2878_v56 = vpop.eup %2877  ;;  %2889 = vtanh.f32 %v1520_v51 }
0x1159   : > { %v2880_v57 = vpop.eup %2879  ;;  %2891 = vtanh.f32 %v1522_v54 }
0x115a   : > { %v2882_v58 = vpop.eup %2881 }
0x115b   : > { %v2884_v59 = vpop.eup %2883  ;;  %v1532_v60 = vpack.c.bf16 %v2882_v58, %v2878_v56 }
0x115c   : > { %v1533_v61 = vpack.c.bf16 %v2884_v59, %v2880_v57 }
0x115e   : > { %1536 = vmatprep.subr.bf16.mxu0 %v1533_v61 }
0x115f   : > { %1537 = vmatpush1.bf16.msra.mxu0 %v1532_v60 }
0x1160   : > { %v2886_v62 = vpop.eup %2885 }
0x1161   : > { %v2888_v63 = vpop.eup %2887 }
0x1162   : > { %v2890_v1 = vpop.eup %2889 }
0x1163   : > { %v2892_v2 = vpop.eup %2891  ;;  %v1534_v3 = vpack.c.bf16 %v2890_v1, %v2886_v62 }
0x1164   : > { %v1535_v4 = vpack.c.bf16 %v2892_v2, %v2888_v63 }
0x1166   : > { %1538 = vmatprep.subr.bf16.mxu0 %v1535_v4 }
0x1167   : > { %1539 = vmatpush1.bf16.msra.mxu0 %v1534_v3 }
0x116a   : > { %2483 = vmatmul.mubr.msk.bf16.vlgmr.msra.gmra.mrb[72].mxu0 %vm294_vm0, %v3443_v17 }
0x116b   : > { %1578 = vmatprep.mubr.bf16.mxu0 %v3237_v0 }
0x1172   : > { %2484 = vmatmul.mubr.msk.bf16.gmra.mrb[76].mxu0 %vm294_vm0, %v3445_v20 }
0x1173   : > { %1698 = vmatprep.mubr.bf16.mxu0 %v3237_v0 }
0x123d   : > { %v1570_v5 = vpop.f32.mrb[72].mxu0 }
0x123e   : > { %v1571_v6 = vadd.f32 %v1570_v5, %v3474_v36  ;;  %v1572_v7 = vpop.f32.mrb[73].mxu0 }
0x123f   : > { %v1573_v8 = vadd.f32 %v1572_v7, %v3476_v38  ;;  %v1574_v9 = vpop.f32.mrb[74].mxu0 }
0x1240   : > { %2893 = vtanh.f32 %v1571_v6  ;;  %v1575_v10 = vadd.f32 %v1574_v9, %v3479_v41  ;;  %v1576_v11 = vpop.f32.mrb[75].mxu0 }
0x1241   : > { %2895 = vtanh.f32 %v1573_v8  ;;  %v1577_v12 = vadd.f32 %v1576_v11, %v3481_v44 }
0x1242   : > { %2897 = vtanh.f32 %v1575_v10 }
0x1243   : > { %2899 = vtanh.f32 %v1577_v12 }
0x1245   : > { %v1580_v13 = vpop.f32.mrb[76].mxu0 }
0x1246   : > { %v1581_v14 = vadd.f32 %v1580_v13, %v3486_v47  ;;  %v1582_v15 = vpop.f32.mrb[77].mxu0 }
0x1247   : > { %v1583_v16 = vadd.f32 %v1582_v15, %v3488_v50  ;;  %v1584_v18 = vpop.f32.mrb[78].mxu0 }
0x1248   : > { %2901 = vtanh.f32 %v1581_v14  ;;  %v1585_v19 = vadd.f32 %v1584_v18, %v3490_v52  ;;  %v1586_v21 = vpop.f32.mrb[79].mxu0 }
0x1249   : > { %2903 = vtanh.f32 %v1583_v16  ;;  %v1587_v22 = vadd.f32 %v1586_v21, %v3493_v55 }
0x124a   : > { %v2894_v23 = vpop.eup %2893  ;;  %2905 = vtanh.f32 %v1585_v19 }
0x124b   : > { %v2896_v24 = vpop.eup %2895  ;;  %2907 = vtanh.f32 %v1587_v22 }
0x124c   : > { %v2898_v25 = vpop.eup %2897 }
0x124d   : > { %v2900_v26 = vpop.eup %2899  ;;  %v1597_v27 = vpack.c.bf16 %v2898_v25, %v2894_v23 }
0x124e   : > { %v1598_v28 = vpack.c.bf16 %v2900_v26, %v2896_v24 }
0x1250   : > { %1601 = vmatprep.subr.bf16.mxu1 %v1598_v28 }
0x1251   : > { %1602 = vmatpush1.bf16.msra.mxu1 %v1597_v27 }
0x1252   : > { %v2902_v29 = vpop.eup %2901 }
0x1253   : > { %v2904_v30 = vpop.eup %2903 }
0x1254   : > { %v2906_v31 = vpop.eup %2905 }
0x1255   : > { %v2908_v32 = vpop.eup %2907  ;;  %v1599_v33 = vpack.c.bf16 %v2906_v31, %v2902_v29 }
0x1256   : > { %v1600_v34 = vpack.c.bf16 %v2908_v32, %v2904_v30 }
0x1258   : > { %1603 = vmatprep.subr.bf16.mxu1 %v1600_v34 }
0x1259   : > { %1604 = vmatpush1.bf16.msra.mxu1 %v1599_v33 }
0x125c   : > { %2485 = vmatmul.mubr.msk.bf16.vlgmr.msra.gmra.mrb[76].mxu1 %vm294_vm0, %v3443_v17 }
0x125d   : > { %1643 = vmatprep.mubr.bf16.mxu1 %v3237_v0 }
0x1264   : > { %2486 = vmatmul.mubr.msk.bf16.gmra.mrb[80].mxu1 %vm294_vm0, %v3445_v20 }
0x1265   : > { %1763 = vmatprep.mubr.bf16.mxu1 %v3237_v0 }
0x132f   : > { %v1635_v35 = vpop.f32.mrb[76].mxu1 }
0x1330   : > { %v1636_v37 = vadd.f32 %v1635_v35, %v3474_v36  ;;  %v1637_v39 = vpop.f32.mrb[77].mxu1 }
0x1331   : > { %v1638_v40 = vadd.f32 %v1637_v39, %v3476_v38  ;;  %v1639_v42 = vpop.f32.mrb[78].mxu1 }
0x1332   : > { %2909 = vtanh.f32 %v1636_v37  ;;  %v1640_v43 = vadd.f32 %v1639_v42, %v3479_v41  ;;  %v1641_v45 = vpop.f32.mrb[79].mxu1 }
0x1333   : > { %2911 = vtanh.f32 %v1638_v40  ;;  %v1642_v46 = vadd.f32 %v1641_v45, %v3481_v44 }
0x1334   : > { %2913 = vtanh.f32 %v1640_v43 }
0x1335   : > { %2915 = vtanh.f32 %v1642_v46 }
0x1337   : > { %v1645_v48 = vpop.f32.mrb[80].mxu1 }
0x1338   : > { %v1646_v49 = vadd.f32 %v1645_v48, %v3486_v47  ;;  %v1647_v51 = vpop.f32.mrb[81].mxu1 }
0x1339   : > { %v1648_v53 = vadd.f32 %v1647_v51, %v3488_v50  ;;  %v1649_v54 = vpop.f32.mrb[82].mxu1 }
0x133a   : > { %2917 = vtanh.f32 %v1646_v49  ;;  %v1650_v56 = vadd.f32 %v1649_v54, %v3490_v52  ;;  %v1651_v57 = vpop.f32.mrb[83].mxu1 }
0x133b   : > { %2919 = vtanh.f32 %v1648_v53  ;;  %v1652_v58 = vadd.f32 %v1651_v57, %v3493_v55 }
0x133c   : > { %v2910_v59 = vpop.eup %2909  ;;  %2921 = vtanh.f32 %v1650_v56 }
0x133d   : > { %v2912_v60 = vpop.eup %2911  ;;  %2923 = vtanh.f32 %v1652_v58 }
0x133e   : > { %v2914_v61 = vpop.eup %2913 }
0x133f   : > { %v2916_v62 = vpop.eup %2915  ;;  %v1662_v63 = vpack.c.bf16 %v2914_v61, %v2910_v59 }
0x1340   : > { %v1663_v1 = vpack.c.bf16 %v2916_v62, %v2912_v60 }
0x1342   : > { %1666 = vmatprep.subr.bf16.mxu0 %v1663_v1 }
0x1343   : > { %1667 = vmatpush1.bf16.msra.mxu0 %v1662_v63 }
0x1344   : > { %v2918_v2 = vpop.eup %2917 }
0x1345   : > { %v2920_v3 = vpop.eup %2919 }
0x1346   : > { %v2922_v4 = vpop.eup %2921 }
0x1347   : > { %v2924_v5 = vpop.eup %2923  ;;  %v1664_v6 = vpack.c.bf16 %v2922_v4, %v2918_v2 }
0x1348   : > { %v1665_v7 = vpack.c.bf16 %v2924_v5, %v2920_v3 }
0x134a   : > { %1668 = vmatprep.subr.bf16.mxu0 %v1665_v7 }
0x134b   : > { %1669 = vmatpush1.bf16.msra.mxu0 %v1664_v6 }
0x134e   : > { %2487 = vmatmul.mubr.msk.bf16.vlgmr.msra.gmra.mrb[80].mxu0 %vm294_vm0, %v3443_v17 }
0x134f   : > { %1708 = vmatprep.mubr.bf16.mxu0 %v3237_v0 }
0x1356   : > { %2488 = vmatmul.mubr.msk.bf16.gmra.mrb[84].mxu0 %vm294_vm0, %v3445_v20 }
0x1357   : > { %1828 = vmatprep.mubr.bf16.mxu0 %v3237_v0 }
0x1421   : > { %v1700_v8 = vpop.f32.mrb[80].mxu0 }
0x1422   : > { %v1701_v9 = vadd.f32 %v1700_v8, %v3474_v36  ;;  %v1702_v10 = vpop.f32.mrb[81].mxu0 }
0x1423   : > { %v1703_v11 = vadd.f32 %v1702_v10, %v3476_v38  ;;  %v1704_v12 = vpop.f32.mrb[82].mxu0 }
0x1424   : > { %2925 = vtanh.f32 %v1701_v9  ;;  %v1705_v13 = vadd.f32 %v1704_v12, %v3479_v41  ;;  %v1706_v14 = vpop.f32.mrb[83].mxu0 }
0x1425   : > { %2927 = vtanh.f32 %v1703_v11  ;;  %v1707_v15 = vadd.f32 %v1706_v14, %v3481_v44 }
0x1426   : > { %2929 = vtanh.f32 %v1705_v13 }
0x1427   : > { %2931 = vtanh.f32 %v1707_v15 }
0x1429   : > { %v1710_v16 = vpop.f32.mrb[84].mxu0 }
0x142a   : > { %v1711_v18 = vadd.f32 %v1710_v16, %v3486_v47  ;;  %v1712_v19 = vpop.f32.mrb[85].mxu0 }
0x142b   : > { %v1713_v21 = vadd.f32 %v1712_v19, %v3488_v50  ;;  %v1714_v22 = vpop.f32.mrb[86].mxu0 }
0x142c   : > { %2933 = vtanh.f32 %v1711_v18  ;;  %v1715_v23 = vadd.f32 %v1714_v22, %v3490_v52  ;;  %v1716_v24 = vpop.f32.mrb[87].mxu0 }
0x142d   : > { %2935 = vtanh.f32 %v1713_v21  ;;  %v1717_v25 = vadd.f32 %v1716_v24, %v3493_v55 }
0x142e   : > { %v2926_v26 = vpop.eup %2925  ;;  %2937 = vtanh.f32 %v1715_v23 }
0x142f   : > { %v2928_v27 = vpop.eup %2927  ;;  %2939 = vtanh.f32 %v1717_v25 }
0x1430   : > { %v2930_v28 = vpop.eup %2929 }
0x1431   : > { %v2932_v29 = vpop.eup %2931  ;;  %v1727_v30 = vpack.c.bf16 %v2930_v28, %v2926_v26 }
0x1432   : > { %v1728_v31 = vpack.c.bf16 %v2932_v29, %v2928_v27 }
0x1434   : > { %1731 = vmatprep.subr.bf16.mxu1 %v1728_v31 }
0x1435   : > { %1732 = vmatpush1.bf16.msra.mxu1 %v1727_v30 }
0x1436   : > { %v2934_v32 = vpop.eup %2933 }
0x1437   : > { %v2936_v33 = vpop.eup %2935 }
0x1438   : > { %v2938_v34 = vpop.eup %2937 }
0x1439   : > { %v2940_v35 = vpop.eup %2939  ;;  %v1729_v37 = vpack.c.bf16 %v2938_v34, %v2934_v32 }
0x143a   : > { %v1730_v39 = vpack.c.bf16 %v2940_v35, %v2936_v33 }
0x143c   : > { %1733 = vmatprep.subr.bf16.mxu1 %v1730_v39 }
0x143d   : > { %1734 = vmatpush1.bf16.msra.mxu1 %v1729_v37 }
0x1440   : > { %2489 = vmatmul.mubr.msk.bf16.vlgmr.msra.gmra.mrb[84].mxu1 %vm294_vm0, %v3443_v17 }
0x1441   : > { %1773 = vmatprep.mubr.bf16.mxu1 %v3237_v0 }
0x1448   : > { %2490 = vmatmul.mubr.msk.bf16.gmra.mrb[88].mxu1 %vm294_vm0, %v3445_v20 }
0x1449   : > { %1893 = vmatprep.mubr.bf16.mxu1 %v3237_v0 }
0x1513   : > { %v1765_v40 = vpop.f32.mrb[84].mxu1 }
0x1514   : > { %v1766_v42 = vadd.f32 %v1765_v40, %v3474_v36  ;;  %v1767_v43 = vpop.f32.mrb[85].mxu1 }
0x1515   : > { %v1768_v45 = vadd.f32 %v1767_v43, %v3476_v38  ;;  %v1769_v46 = vpop.f32.mrb[86].mxu1 }
0x1516   : > { %2941 = vtanh.f32 %v1766_v42  ;;  %v1770_v48 = vadd.f32 %v1769_v46, %v3479_v41  ;;  %v1771_v49 = vpop.f32.mrb[87].mxu1 }
0x1517   : > { %2943 = vtanh.f32 %v1768_v45  ;;  %v1772_v51 = vadd.f32 %v1771_v49, %v3481_v44 }
0x1518   : > { %2945 = vtanh.f32 %v1770_v48 }
0x1519   : > { %2947 = vtanh.f32 %v1772_v51 }
0x151b   : > { %v1775_v53 = vpop.f32.mrb[88].mxu1 }
0x151c   : > { %v1776_v54 = vadd.f32 %v1775_v53, %v3486_v47  ;;  %v1777_v56 = vpop.f32.mrb[89].mxu1 }
0x151d   : > { %v1778_v57 = vadd.f32 %v1777_v56, %v3488_v50  ;;  %v1779_v58 = vpop.f32.mrb[90].mxu1 }
0x151e   : > { %2949 = vtanh.f32 %v1776_v54  ;;  %v1780_v59 = vadd.f32 %v1779_v58, %v3490_v52  ;;  %v1781_v60 = vpop.f32.mrb[91].mxu1 }
0x151f   : > { %2951 = vtanh.f32 %v1778_v57  ;;  %v1782_v61 = vadd.f32 %v1781_v60, %v3493_v55 }
0x1520   : > { %v2942_v62 = vpop.eup %2941  ;;  %2953 = vtanh.f32 %v1780_v59 }
0x1521   : > { %v2944_v63 = vpop.eup %2943  ;;  %2955 = vtanh.f32 %v1782_v61 }
0x1522   : > { %v2946_v1 = vpop.eup %2945 }
0x1523   : > { %v2948_v2 = vpop.eup %2947  ;;  %v1792_v3 = vpack.c.bf16 %v2946_v1, %v2942_v62 }
0x1524   : > { %v1793_v4 = vpack.c.bf16 %v2948_v2, %v2944_v63 }
0x1526   : > { %1796 = vmatprep.subr.bf16.mxu0 %v1793_v4 }
0x1527   : > { %1797 = vmatpush1.bf16.msra.mxu0 %v1792_v3 }
0x1528   : > { %v2950_v5 = vpop.eup %2949 }
0x1529   : > { %v2952_v6 = vpop.eup %2951 }
0x152a   : > { %v2954_v7 = vpop.eup %2953 }
0x152b   : > { %v2956_v8 = vpop.eup %2955  ;;  %v1794_v9 = vpack.c.bf16 %v2954_v7, %v2950_v5 }
0x152c   : > { %v1795_v10 = vpack.c.bf16 %v2956_v8, %v2952_v6 }
0x152e   : > { %1798 = vmatprep.subr.bf16.mxu0 %v1795_v10 }
0x152f   : > { %1799 = vmatpush1.bf16.msra.mxu0 %v1794_v9 }
0x1532   : > { %2491 = vmatmul.mubr.msk.bf16.vlgmr.msra.gmra.mrb[88].mxu0 %vm294_vm0, %v3443_v17 }
0x1533   : > { %1838 = vmatprep.mubr.bf16.mxu0 %v3237_v0 }
0x153a   : > { %2492 = vmatmul.mubr.msk.bf16.gmra.mrb[92].mxu0 %vm294_vm0, %v3445_v20 }
0x153b   : > { %1958 = vmatprep.mubr.bf16.mxu0 %v3237_v0 }
0x1605   : > { %v1830_v11 = vpop.f32.mrb[88].mxu0 }
0x1606   : > { %v1831_v12 = vadd.f32 %v1830_v11, %v3474_v36  ;;  %v1832_v13 = vpop.f32.mrb[89].mxu0 }
0x1607   : > { %v1833_v14 = vadd.f32 %v1832_v13, %v3476_v38  ;;  %v1834_v15 = vpop.f32.mrb[90].mxu0 }
0x1608   : > { %2957 = vtanh.f32 %v1831_v12  ;;  %v1835_v16 = vadd.f32 %v1834_v15, %v3479_v41  ;;  %v1836_v18 = vpop.f32.mrb[91].mxu0 }
0x1609   : > { %2959 = vtanh.f32 %v1833_v14  ;;  %v1837_v19 = vadd.f32 %v1836_v18, %v3481_v44 }
0x160a   : > { %2961 = vtanh.f32 %v1835_v16 }
0x160b   : > { %2963 = vtanh.f32 %v1837_v19 }
0x160d   : > { %v1840_v21 = vpop.f32.mrb[92].mxu0 }
0x160e   : > { %v1841_v22 = vadd.f32 %v1840_v21, %v3486_v47  ;;  %v1842_v23 = vpop.f32.mrb[93].mxu0 }
0x160f   : > { %v1843_v24 = vadd.f32 %v1842_v23, %v3488_v50  ;;  %v1844_v25 = vpop.f32.mrb[94].mxu0 }
0x1610   : > { %2965 = vtanh.f32 %v1841_v22  ;;  %v1845_v26 = vadd.f32 %v1844_v25, %v3490_v52  ;;  %v1846_v27 = vpop.f32.mrb[95].mxu0 }
0x1611   : > { %2967 = vtanh.f32 %v1843_v24  ;;  %v1847_v28 = vadd.f32 %v1846_v27, %v3493_v55 }
0x1612   : > { %v2958_v29 = vpop.eup %2957  ;;  %2969 = vtanh.f32 %v1845_v26 }
0x1613   : > { %v2960_v30 = vpop.eup %2959  ;;  %2971 = vtanh.f32 %v1847_v28 }
0x1614   : > { %v2962_v31 = vpop.eup %2961 }
0x1615   : > { %v2964_v32 = vpop.eup %2963  ;;  %v1857_v33 = vpack.c.bf16 %v2962_v31, %v2958_v29 }
0x1616   : > { %v1858_v34 = vpack.c.bf16 %v2964_v32, %v2960_v30 }
0x1618   : > { %1861 = vmatprep.subr.bf16.mxu1 %v1858_v34 }
0x1619   : > { %1862 = vmatpush1.bf16.msra.mxu1 %v1857_v33 }
0x161a   : > { %v2966_v35 = vpop.eup %2965 }
0x161b   : > { %v2968_v37 = vpop.eup %2967 }
0x161c   : > { %v2970_v39 = vpop.eup %2969 }
0x161d   : > { %v2972_v40 = vpop.eup %2971  ;;  %v1859_v42 = vpack.c.bf16 %v2970_v39, %v2966_v35 }
0x161e   : > { %v1860_v43 = vpack.c.bf16 %v2972_v40, %v2968_v37 }
0x1620   : > { %1863 = vmatprep.subr.bf16.mxu1 %v1860_v43 }
0x1621   : > { %1864 = vmatpush1.bf16.msra.mxu1 %v1859_v42 }
0x1624   : > { %2493 = vmatmul.mubr.msk.bf16.vlgmr.msra.gmra.mrb[92].mxu1 %vm294_vm0, %v3443_v17 }
0x1625   : > { %1903 = vmatprep.mubr.bf16.mxu1 %v3237_v0 }
0x162c   : > { %2494 = vmatmul.mubr.msk.bf16.gmra.mrb[96].mxu1 %vm294_vm0, %v3445_v20 }
0x162d   : > { %2023 = vmatprep.mubr.bf16.mxu1 %v3237_v0 }
0x16f7   : > { %v1895_v45 = vpop.f32.mrb[92].mxu1 }
0x16f8   : > { %v1896_v46 = vadd.f32 %v1895_v45, %v3474_v36  ;;  %v1897_v48 = vpop.f32.mrb[93].mxu1 }
0x16f9   : > { %v1898_v49 = vadd.f32 %v1897_v48, %v3476_v38  ;;  %v1899_v51 = vpop.f32.mrb[94].mxu1 }
0x16fa   : > { %2973 = vtanh.f32 %v1896_v46  ;;  %v1900_v53 = vadd.f32 %v1899_v51, %v3479_v41  ;;  %v1901_v54 = vpop.f32.mrb[95].mxu1 }
0x16fb   : > { %2975 = vtanh.f32 %v1898_v49  ;;  %v1902_v56 = vadd.f32 %v1901_v54, %v3481_v44 }
0x16fc   : > { %2977 = vtanh.f32 %v1900_v53 }
0x16fd   : > { %2979 = vtanh.f32 %v1902_v56 }
0x16ff   : > { %v1905_v57 = vpop.f32.mrb[96].mxu1 }
0x1700   : > { %v1906_v58 = vadd.f32 %v1905_v57, %v3486_v47  ;;  %v1907_v59 = vpop.f32.mrb[97].mxu1 }
0x1701   : > { %v1908_v60 = vadd.f32 %v1907_v59, %v3488_v50  ;;  %v1909_v61 = vpop.f32.mrb[98].mxu1 }
0x1702   : > { %2981 = vtanh.f32 %v1906_v58  ;;  %v1910_v62 = vadd.f32 %v1909_v61, %v3490_v52  ;;  %v1911_v63 = vpop.f32.mrb[99].mxu1 }
0x1703   : > { %2983 = vtanh.f32 %v1908_v60  ;;  %v1912_v1 = vadd.f32 %v1911_v63, %v3493_v55 }
0x1704   : > { %v2974_v2 = vpop.eup %2973  ;;  %2985 = vtanh.f32 %v1910_v62 }
0x1705   : > { %v2976_v3 = vpop.eup %2975  ;;  %2987 = vtanh.f32 %v1912_v1 }
0x1706   : > { %v2978_v4 = vpop.eup %2977 }
0x1707   : > { %v2980_v5 = vpop.eup %2979  ;;  %v1922_v6 = vpack.c.bf16 %v2978_v4, %v2974_v2 }
0x1708   : > { %v1923_v7 = vpack.c.bf16 %v2980_v5, %v2976_v3 }
0x170a   : > { %1926 = vmatprep.subr.bf16.mxu0 %v1923_v7 }
0x170b   : > { %1927 = vmatpush1.bf16.msra.mxu0 %v1922_v6 }
0x170c   : > { %v2982_v8 = vpop.eup %2981 }
0x170d   : > { %v2984_v9 = vpop.eup %2983 }
0x170e   : > { %v2986_v10 = vpop.eup %2985 }
0x170f   : > { %v2988_v11 = vpop.eup %2987  ;;  %v1924_v12 = vpack.c.bf16 %v2986_v10, %v2982_v8 }
0x1710   : > { %v1925_v13 = vpack.c.bf16 %v2988_v11, %v2984_v9 }
0x1712   : > { %1928 = vmatprep.subr.bf16.mxu0 %v1925_v13 }
0x1713   : > { %1929 = vmatpush1.bf16.msra.mxu0 %v1924_v12 }
0x1716   : > { %2495 = vmatmul.mubr.msk.bf16.vlgmr.msra.gmra.mrb[96].mxu0 %vm294_vm0, %v3443_v17 }
0x1717   : > { %1968 = vmatprep.mubr.bf16.mxu0 %v3237_v0 }
0x171e   : > { %2496 = vmatmul.mubr.msk.bf16.gmra.mrb[100].mxu0 %vm294_vm0, %v3445_v20 }
0x171f   : > { %2088 = vmatprep.mubr.bf16.mxu0 %v3237_v0 }
0x17e9   : > { %v1960_v14 = vpop.f32.mrb[96].mxu0 }
0x17ea   : > { %v1961_v15 = vadd.f32 %v1960_v14, %v3474_v36  ;;  %v1962_v16 = vpop.f32.mrb[97].mxu0 }
0x17eb   : > { %v1963_v18 = vadd.f32 %v1962_v16, %v3476_v38  ;;  %v1964_v19 = vpop.f32.mrb[98].mxu0 }
0x17ec   : > { %2989 = vtanh.f32 %v1961_v15  ;;  %v1965_v21 = vadd.f32 %v1964_v19, %v3479_v41  ;;  %v1966_v22 = vpop.f32.mrb[99].mxu0 }
0x17ed   : > { %2991 = vtanh.f32 %v1963_v18  ;;  %v1967_v23 = vadd.f32 %v1966_v22, %v3481_v44 }
0x17ee   : > { %2993 = vtanh.f32 %v1965_v21 }
0x17ef   : > { %2995 = vtanh.f32 %v1967_v23 }
0x17f1   : > { %v1970_v24 = vpop.f32.mrb[100].mxu0 }
0x17f2   : > { %v1971_v25 = vadd.f32 %v1970_v24, %v3486_v47  ;;  %v1972_v26 = vpop.f32.mrb[101].mxu0 }
0x17f3   : > { %v1973_v27 = vadd.f32 %v1972_v26, %v3488_v50  ;;  %v1974_v28 = vpop.f32.mrb[102].mxu0 }
0x17f4   : > { %2997 = vtanh.f32 %v1971_v25  ;;  %v1975_v29 = vadd.f32 %v1974_v28, %v3490_v52  ;;  %v1976_v30 = vpop.f32.mrb[103].mxu0 }
0x17f5   : > { %2999 = vtanh.f32 %v1973_v27  ;;  %v1977_v31 = vadd.f32 %v1976_v30, %v3493_v55 }
0x17f6   : > { %v2990_v32 = vpop.eup %2989  ;;  %3001 = vtanh.f32 %v1975_v29 }
0x17f7   : > { %v2992_v33 = vpop.eup %2991  ;;  %3003 = vtanh.f32 %v1977_v31 }
0x17f8   : > { %v2994_v34 = vpop.eup %2993 }
0x17f9   : > { %v2996_v35 = vpop.eup %2995  ;;  %v1987_v37 = vpack.c.bf16 %v2994_v34, %v2990_v32 }
0x17fa   : > { %v1988_v39 = vpack.c.bf16 %v2996_v35, %v2992_v33 }
0x17fc   : > { %1991 = vmatprep.subr.bf16.mxu1 %v1988_v39 }
0x17fd   : > { %1992 = vmatpush1.bf16.msra.mxu1 %v1987_v37 }
0x17fe   : > { %v2998_v40 = vpop.eup %2997 }
0x17ff   : > { %v3000_v42 = vpop.eup %2999 }
0x1800   : > { %v3002_v43 = vpop.eup %3001 }
0x1801   : > { %v3004_v45 = vpop.eup %3003  ;;  %v1989_v46 = vpack.c.bf16 %v3002_v43, %v2998_v40 }
0x1802   : > { %v1990_v48 = vpack.c.bf16 %v3004_v45, %v3000_v42 }
0x1804   : > { %1993 = vmatprep.subr.bf16.mxu1 %v1990_v48 }
0x1805   : > { %1994 = vmatpush1.bf16.msra.mxu1 %v1989_v46 }
0x1808   : > { %2497 = vmatmul.mubr.msk.bf16.vlgmr.msra.gmra.mrb[100].mxu1 %vm294_vm0, %v3443_v17 }
0x1809   : > { %2033 = vmatprep.mubr.bf16.mxu1 %v3237_v0 }
0x1810   : > { %2498 = vmatmul.mubr.msk.bf16.gmra.mrb[104].mxu1 %vm294_vm0, %v3445_v20 }
0x1811   : > { %2153 = vmatprep.mubr.bf16.mxu1 %v3237_v0 }
0x18db   : > { %v2025_v49 = vpop.f32.mrb[100].mxu1 }
0x18dc   : > { %v2026_v51 = vadd.f32 %v2025_v49, %v3474_v36  ;;  %v2027_v53 = vpop.f32.mrb[101].mxu1 }
0x18dd   : > { %v2028_v54 = vadd.f32 %v2027_v53, %v3476_v38  ;;  %v2029_v56 = vpop.f32.mrb[102].mxu1 }
0x18de   : > { %3005 = vtanh.f32 %v2026_v51  ;;  %v2030_v57 = vadd.f32 %v2029_v56, %v3479_v41  ;;  %v2031_v58 = vpop.f32.mrb[103].mxu1 }
0x18df   : > { %3007 = vtanh.f32 %v2028_v54  ;;  %v2032_v59 = vadd.f32 %v2031_v58, %v3481_v44 }
0x18e0   : > { %3009 = vtanh.f32 %v2030_v57 }
0x18e1   : > { %3011 = vtanh.f32 %v2032_v59 }
0x18e3   : > { %v2035_v60 = vpop.f32.mrb[104].mxu1 }
0x18e4   : > { %v2036_v61 = vadd.f32 %v2035_v60, %v3486_v47  ;;  %v2037_v62 = vpop.f32.mrb[105].mxu1 }
0x18e5   : > { %v2038_v63 = vadd.f32 %v2037_v62, %v3488_v50  ;;  %v2039_v1 = vpop.f32.mrb[106].mxu1 }
0x18e6   : > { %3013 = vtanh.f32 %v2036_v61  ;;  %v2040_v2 = vadd.f32 %v2039_v1, %v3490_v52  ;;  %v2041_v3 = vpop.f32.mrb[107].mxu1 }
0x18e7   : > { %3015 = vtanh.f32 %v2038_v63  ;;  %v2042_v4 = vadd.f32 %v2041_v3, %v3493_v55 }
0x18e8   : > { %v3006_v5 = vpop.eup %3005  ;;  %3017 = vtanh.f32 %v2040_v2 }
0x18e9   : > { %v3008_v6 = vpop.eup %3007  ;;  %3019 = vtanh.f32 %v2042_v4 }
0x18ea   : > { %v3010_v7 = vpop.eup %3009 }
0x18eb   : > { %v3012_v8 = vpop.eup %3011  ;;  %v2052_v9 = vpack.c.bf16 %v3010_v7, %v3006_v5 }
0x18ec   : > { %v2053_v10 = vpack.c.bf16 %v3012_v8, %v3008_v6 }
0x18ee   : > { %2056 = vmatprep.subr.bf16.mxu0 %v2053_v10 }
0x18ef   : > { %2057 = vmatpush1.bf16.msra.mxu0 %v2052_v9 }
0x18f0   : > { %v3014_v11 = vpop.eup %3013 }
0x18f1   : > { %v3016_v12 = vpop.eup %3015 }
0x18f2   : > { %v3018_v13 = vpop.eup %3017 }
0x18f3   : > { %v3020_v14 = vpop.eup %3019  ;;  %v2054_v15 = vpack.c.bf16 %v3018_v13, %v3014_v11 }
0x18f4   : > { %v2055_v16 = vpack.c.bf16 %v3020_v14, %v3016_v12 }
0x18f6   : > { %2058 = vmatprep.subr.bf16.mxu0 %v2055_v16 }
0x18f7   : > { %2059 = vmatpush1.bf16.msra.mxu0 %v2054_v15 }
0x18fa   : > { %2499 = vmatmul.mubr.msk.bf16.vlgmr.msra.gmra.mrb[104].mxu0 %vm294_vm0, %v3443_v17 }
0x18fb   : > { %2098 = vmatprep.mubr.bf16.mxu0 %v3237_v0 }
0x1902   : > { %2500 = vmatmul.mubr.msk.bf16.gmra.mrb[108].mxu0 %vm294_vm0, %v3445_v20 }
0x1903   : > { %2218 = vmatprep.mubr.bf16.mxu0 %v3237_v0 }
0x19cd   : > { %v2090_v18 = vpop.f32.mrb[104].mxu0 }
0x19ce   : > { %v2091_v19 = vadd.f32 %v2090_v18, %v3474_v36  ;;  %v2092_v21 = vpop.f32.mrb[105].mxu0 }
0x19cf   : > { %v2093_v22 = vadd.f32 %v2092_v21, %v3476_v38  ;;  %v2094_v23 = vpop.f32.mrb[106].mxu0 }
0x19d0   : > { %3021 = vtanh.f32 %v2091_v19  ;;  %v2095_v24 = vadd.f32 %v2094_v23, %v3479_v41  ;;  %v2096_v25 = vpop.f32.mrb[107].mxu0 }
0x19d1   : > { %3023 = vtanh.f32 %v2093_v22  ;;  %v2097_v26 = vadd.f32 %v2096_v25, %v3481_v44 }
0x19d2   : > { %3025 = vtanh.f32 %v2095_v24 }
0x19d3   : > { %3027 = vtanh.f32 %v2097_v26 }
0x19d5   : > { %v2100_v27 = vpop.f32.mrb[108].mxu0 }
0x19d6   : > { %v2101_v28 = vadd.f32 %v2100_v27, %v3486_v47  ;;  %v2102_v29 = vpop.f32.mrb[109].mxu0 }
0x19d7   : > { %v2103_v30 = vadd.f32 %v2102_v29, %v3488_v50  ;;  %v2104_v31 = vpop.f32.mrb[110].mxu0 }
0x19d8   : > { %3029 = vtanh.f32 %v2101_v28  ;;  %v2105_v32 = vadd.f32 %v2104_v31, %v3490_v52  ;;  %v2106_v33 = vpop.f32.mrb[111].mxu0 }
0x19d9   : > { %3031 = vtanh.f32 %v2103_v30  ;;  %v2107_v34 = vadd.f32 %v2106_v33, %v3493_v55 }
0x19da   : > { %v3022_v35 = vpop.eup %3021  ;;  %3033 = vtanh.f32 %v2105_v32 }
0x19db   : > { %v3024_v37 = vpop.eup %3023  ;;  %3035 = vtanh.f32 %v2107_v34 }
0x19dc   : > { %v3026_v39 = vpop.eup %3025 }
0x19dd   : > { %v3028_v40 = vpop.eup %3027  ;;  %v2117_v42 = vpack.c.bf16 %v3026_v39, %v3022_v35 }
0x19de   : > { %v2118_v43 = vpack.c.bf16 %v3028_v40, %v3024_v37 }
0x19e0   : > { %2121 = vmatprep.subr.bf16.mxu1 %v2118_v43 }
0x19e1   : > { %2122 = vmatpush1.bf16.msra.mxu1 %v2117_v42 }
0x19e2   : > { %v3030_v45 = vpop.eup %3029 }
0x19e3   : > { %v3032_v46 = vpop.eup %3031 }
0x19e4   : > { %v3034_v48 = vpop.eup %3033 }
0x19e5   : > { %v3036_v49 = vpop.eup %3035  ;;  %v2119_v51 = vpack.c.bf16 %v3034_v48, %v3030_v45 }
0x19e6   : > { %v2120_v53 = vpack.c.bf16 %v3036_v49, %v3032_v46 }
0x19e8   : > { %2123 = vmatprep.subr.bf16.mxu1 %v2120_v53 }
0x19e9   : > { %2124 = vmatpush1.bf16.msra.mxu1 %v2119_v51 }
0x19ec   : > { %2501 = vmatmul.mubr.msk.bf16.vlgmr.msra.gmra.mrb[108].mxu1 %vm294_vm0, %v3443_v17 }
0x19ed   : > { %2163 = vmatprep.mubr.bf16.mxu1 %v3237_v0 }
0x19f4   : > { %2502 = vmatmul.mubr.msk.bf16.gmra.mrb[112].mxu1 %vm294_vm0, %v3445_v20 }
0x19f5   : > { %2283 = vmatprep.mubr.bf16.mxu1 %v3237_v0 }
0x1abf   : > { %v2155_v54 = vpop.f32.mrb[108].mxu1 }
0x1ac0   : > { %v2156_v56 = vadd.f32 %v2155_v54, %v3474_v36  ;;  %v2157_v57 = vpop.f32.mrb[109].mxu1 }
0x1ac1   : > { %v2158_v58 = vadd.f32 %v2157_v57, %v3476_v38  ;;  %v2159_v59 = vpop.f32.mrb[110].mxu1 }
0x1ac2   : > { %3037 = vtanh.f32 %v2156_v56  ;;  %v2160_v60 = vadd.f32 %v2159_v59, %v3479_v41  ;;  %v2161_v61 = vpop.f32.mrb[111].mxu1 }
0x1ac3   : > { %3039 = vtanh.f32 %v2158_v58  ;;  %v2162_v62 = vadd.f32 %v2161_v61, %v3481_v44 }
0x1ac4   : > { %3041 = vtanh.f32 %v2160_v60 }
0x1ac5   : > { %3043 = vtanh.f32 %v2162_v62 }
0x1ac7   : > { %v2165_v63 = vpop.f32.mrb[112].mxu1 }
0x1ac8   : > { %v2166_v1 = vadd.f32 %v2165_v63, %v3486_v47  ;;  %v2167_v2 = vpop.f32.mrb[113].mxu1 }
0x1ac9   : > { %v2168_v3 = vadd.f32 %v2167_v2, %v3488_v50  ;;  %v2169_v4 = vpop.f32.mrb[114].mxu1 }
0x1aca   : > { %3045 = vtanh.f32 %v2166_v1  ;;  %v2170_v5 = vadd.f32 %v2169_v4, %v3490_v52  ;;  %v2171_v6 = vpop.f32.mrb[115].mxu1 }
0x1acb   : > { %3047 = vtanh.f32 %v2168_v3  ;;  %v2172_v7 = vadd.f32 %v2171_v6, %v3493_v55 }
0x1acc   : > { %v3038_v8 = vpop.eup %3037  ;;  %3049 = vtanh.f32 %v2170_v5 }
0x1acd   : > { %v3040_v9 = vpop.eup %3039  ;;  %3051 = vtanh.f32 %v2172_v7 }
0x1ace   : > { %v3042_v10 = vpop.eup %3041 }
0x1acf   : > { %v3044_v11 = vpop.eup %3043  ;;  %v2182_v12 = vpack.c.bf16 %v3042_v10, %v3038_v8 }
0x1ad0   : > { %v2183_v13 = vpack.c.bf16 %v3044_v11, %v3040_v9 }
0x1ad2   : > { %2186 = vmatprep.subr.bf16.mxu0 %v2183_v13 }
0x1ad3   : > { %2187 = vmatpush1.bf16.msra.mxu0 %v2182_v12 }
0x1ad4   : > { %v3046_v14 = vpop.eup %3045 }
0x1ad5   : > { %v3048_v15 = vpop.eup %3047 }
0x1ad6   : > { %v3050_v16 = vpop.eup %3049 }
0x1ad7   : > { %v3052_v18 = vpop.eup %3051  ;;  %v2184_v19 = vpack.c.bf16 %v3050_v16, %v3046_v14 }
0x1ad8   : > { %v2185_v21 = vpack.c.bf16 %v3052_v18, %v3048_v15 }
0x1ada   : > { %2188 = vmatprep.subr.bf16.mxu0 %v2185_v21 }
0x1adb   : > { %2189 = vmatpush1.bf16.msra.mxu0 %v2184_v19 }
0x1ade   : > { %2503 = vmatmul.mubr.msk.bf16.vlgmr.msra.gmra.mrb[112].mxu0 %vm294_vm0, %v3443_v17 }
0x1adf   : > { %2228 = vmatprep.mubr.bf16.mxu0 %v3237_v0 }
0x1ae6   : > { %2504 = vmatmul.mubr.msk.bf16.gmra.mrb[116].mxu0 %vm294_vm0, %v3445_v20 }
0x1bb1   : > { %v2220_v22 = vpop.f32.mrb[112].mxu0 }
0x1bb2   : > { %v2221_v23 = vadd.f32 %v2220_v22, %v3474_v36  ;;  %v2222_v24 = vpop.f32.mrb[113].mxu0 }
0x1bb3   : > { %v2223_v25 = vadd.f32 %v2222_v24, %v3476_v38  ;;  %v2224_v26 = vpop.f32.mrb[114].mxu0 }
0x1bb4   : > { %3053 = vtanh.f32 %v2221_v23  ;;  %v2225_v27 = vadd.f32 %v2224_v26, %v3479_v41  ;;  %v2226_v28 = vpop.f32.mrb[115].mxu0 }
0x1bb5   : > { %3055 = vtanh.f32 %v2223_v25  ;;  %v2227_v29 = vadd.f32 %v2226_v28, %v3481_v44 }
0x1bb6   : > { %3057 = vtanh.f32 %v2225_v27 }
0x1bb7   : > { %3059 = vtanh.f32 %v2227_v29 }
0x1bb9   : > { %v2230_v30 = vpop.f32.mrb[116].mxu0 }
0x1bba   : > { %v2231_v31 = vadd.f32 %v2230_v30, %v3486_v47  ;;  %v2232_v32 = vpop.f32.mrb[117].mxu0 }
0x1bbb   : > { %v2233_v33 = vadd.f32 %v2232_v32, %v3488_v50  ;;  %v2234_v34 = vpop.f32.mrb[118].mxu0 }
0x1bbc   : > { %3061 = vtanh.f32 %v2231_v31  ;;  %v2235_v35 = vadd.f32 %v2234_v34, %v3490_v52  ;;  %v2236_v37 = vpop.f32.mrb[119].mxu0 }
0x1bbd   : > { %3063 = vtanh.f32 %v2233_v33  ;;  %v2237_v39 = vadd.f32 %v2236_v37, %v3493_v55 }
0x1bbe   : > { %v3054_v40 = vpop.eup %3053  ;;  %3065 = vtanh.f32 %v2235_v35 }
0x1bbf   : > { %v3056_v42 = vpop.eup %3055  ;;  %3067 = vtanh.f32 %v2237_v39 }
0x1bc0   : > { %v3058_v43 = vpop.eup %3057 }
0x1bc1   : > { %v3060_v45 = vpop.eup %3059  ;;  %v2247_v46 = vpack.c.bf16 %v3058_v43, %v3054_v40 }
0x1bc2   : > { %v2248_v48 = vpack.c.bf16 %v3060_v45, %v3056_v42 }
0x1bc4   : > { %2251 = vmatprep.subr.bf16.mxu1 %v2248_v48 }
0x1bc5   : > { %2252 = vmatpush1.bf16.msra.mxu1 %v2247_v46 }
0x1bc6   : > { %v3062_v49 = vpop.eup %3061 }
0x1bc7   : > { %v3064_v51 = vpop.eup %3063 }
0x1bc8   : > { %v3066_v53 = vpop.eup %3065 }
0x1bc9   : > { %v3068_v54 = vpop.eup %3067  ;;  %v2249_v56 = vpack.c.bf16 %v3066_v53, %v3062_v49 }
0x1bca   : > { %v2250_v57 = vpack.c.bf16 %v3068_v54, %v3064_v51 }
0x1bcc   : > { %2253 = vmatprep.subr.bf16.mxu1 %v2250_v57 }
0x1bcd   : > { %2254 = vmatpush1.bf16.msra.mxu1 %v2249_v56 }
0x1bd0   : > { %2505 = vmatmul.mubr.msk.bf16.vlgmr.msra.gmra.mrb[116].mxu1 %vm294_vm0, %v3443_v17 }
0x1bd1   : > { %2293 = vmatprep.mubr.bf16.mxu1 %v3237_v0 }
0x1bd8   : > { %2506 = vmatmul.mubr.msk.bf16.gmra.mrb[120].mxu1 %vm294_vm0, %v3445_v20 }
0x1ca3   : > { %v2285_v58 = vpop.f32.mrb[116].mxu1 }
0x1ca4   : > { %v2286_v59 = vadd.f32 %v2285_v58, %v3474_v36  ;;  %v2287_v60 = vpop.f32.mrb[117].mxu1 }
0x1ca5   : > { %v2288_v61 = vadd.f32 %v2287_v60, %v3476_v38  ;;  %v2289_v62 = vpop.f32.mrb[118].mxu1 }
0x1ca6   : > { %3069 = vtanh.f32 %v2286_v59  ;;  %v2290_v63 = vadd.f32 %v2289_v62, %v3479_v41  ;;  %v2291_v1 = vpop.f32.mrb[119].mxu1 }
0x1ca7   : > { %3071 = vtanh.f32 %v2288_v61  ;;  %v2292_v2 = vadd.f32 %v2291_v1, %v3481_v44 }
0x1ca8   : > { %3073 = vtanh.f32 %v2290_v63 }
0x1ca9   : > { %3075 = vtanh.f32 %v2292_v2 }
0x1cab   : > { %v2295_v0 = vpop.f32.mrb[120].mxu1 }
0x1cac   : > { %v2296_v17 = vadd.f32 %v2295_v0, %v3486_v47  ;;  %v2297_v20 = vpop.f32.mrb[121].mxu1 }
0x1cad   : > { %v2298_v36 = vadd.f32 %v2297_v20, %v3488_v50  ;;  %v2299_v3 = vpop.f32.mrb[122].mxu1 }
0x1cae   : > { %3077 = vtanh.f32 %v2296_v17  ;;  %v2300_v38 = vadd.f32 %v2299_v3, %v3490_v52  ;;  %v2301_v4 = vpop.f32.mrb[123].mxu1 }
0x1caf   : > { %3079 = vtanh.f32 %v2298_v36  ;;  %v2302_v41 = vadd.f32 %v2301_v4, %v3493_v55 }
0x1cb0   : > { %v3070_v5 = vpop.eup %3069  ;;  %3081 = vtanh.f32 %v2300_v38 }
0x1cb1   : > { %v3072_v44 = vpop.eup %3071  ;;  %2312 = vst [vmem:[%s248_s27] sm:$0xff] %v3070_v5  ;;  %3083 = vtanh.f32 %v2302_v41 }
0x1cb2   : > { %v3074_v47 = vpop.eup %3073  ;;  %2313 = vst [vmem:[%s248_s27 + $0x8] sm:$0xff] %v3072_v44 }
0x1cb3   : > { %v3076_v50 = vpop.eup %3075  ;;  %2314 = vst [vmem:[%s248_s27 + $0x10] sm:$0xff] %v3074_v47 }
0x1cb4   : > { %2315 = vst [vmem:[%s248_s27 + $0x18] sm:$0xff] %v3076_v50 }
0x1cb8   : > { %v3078_v52 = vpop.eup %3077 }
0x1cb9   : > { %v3080_v6 = vpop.eup %3079  ;;  %2316 = vst [vmem:[%s248_s27 + $0x20] sm:$0xff] %v3078_v52 }
0x1cba   : > { %v3082_v55 = vpop.eup %3081  ;;  %2317 = vst [vmem:[%s248_s27 + $0x28] sm:$0xff] %v3080_v6 }
0x1cbb   : > { %v3084_v7 = vpop.eup %3083  ;;  %2318 = vst [vmem:[%s248_s27 + $0x30] sm:$0xff] %v3082_v55 }
0x1cbc   : > { %2319 = vst [vmem:[%s248_s27 + $0x38] sm:$0xff] %v3084_v7 }
0x1cbd   : > { %3156 = shalt.err (!%p3153_p5)
}
0x1cbe   : > { %s3157_s9 = scalar_lea.hbm %s3908_s13, 1024  ;;  %s3161_s23 = scalar_lea.hbm %s3963_s4, 2048 }
0x1cbf   : > { %p3158_p9 = scmp.ne.s32.totalorder %s3908_s13, %s3157_s9  ;;  %p3162_p3 = scmp.lt.u32.totalorder %s3908_s13, %s3963_s4 }
0x1cc0   : > { %p3163_p7 = scmp.lt.u32.totalorder %s3161_s23, %s3157_s9  ;;  %p3165_p4 = scmp.lt.u32.totalorder %s3157_s9, %s3908_s13 }
0x1cc1   : > { %p3159_p1 = pnand %p3158_p9, %p3362_p10 }
0x1cc2   : > { %p3164_p13 = por %p3163_p7, %p3162_p3 }
0x1cc3   : > { %p3160_p2 = pneg %p3159_p1 }
0x1cc4   : > { %p3166_p6 = por %p3165_p4, %p3164_p13 }
0x1cc6   : > { %p3167_p8 = pnand %p3166_p6, %p3160_p2 }
0x1cc8   : > { %3170 = shalt.err (!%p3167_p8)
}
0x1cc9   : > { %s3239_s14 = smov 256   ;;  %s3240_s22 = smov 16  }
0x1cca   : > { %2529 = dma.vmem_to_hbm [thread:$0]  (%p3362_p10), %s3910_s21, 1024, %s3908_s13, %s2321_s18, %s3239_s14, %s3239_s14, %s3240_s22  }
0x1ccb PF: > { %s2351_s28 = sand.u32 1, %s3209_s15   ;;  %p3981_p12 = scmp.ne.s32.totalorder %s3971_s26, 0 }
0x1ccc   : > { %p3982_p11 = scmp.ge.s32.totalorder %s3229_s20, 2  ;;  %s2352_s11 = scalar_lea.sflag [#allocation4], %s2351_s28 }
0x1cce   : > { %p2540_p0 = pnand %p3982_p11, %p3981_p12 }
0x1cd0   : > { %3204 = dma.done.wait (!%p2540_p0), %s2352_s11, 1024  }
0x1cd1   : > { %3206 = vsyncadd (!%p2540_p0), %s2352_s11, 4294966272  ;;  %s21_s20 = sadd.s32 1, %s3229_s20   ;;  %s3983_s15 = smov %s3213_s16 }
0x1cd2   : > { %p18_p5 = scmp.ge.s32.totalorder %s21_s20, 4   ;;  %s3984_s16 = smov %s3217_s17 }
0x1cd3   : > { %s3985_s17 = smov %s3371_s10  ;;  %s3986_s18 = smov %s3225_s19 }
0x1cd4   : > { %s3987_s19 = smov %s3989_s5  ;;  %20 = sbr.rel (!%p18_p5) target bundleno = 7 (0x7), region = 85 }
0x1cdb   :  { %2357 = vsyncpa [#allocation3], 1 }
0x1cdc   :  { %2359 = vsyncpa [#allocation3 + $0x1], 1 }
0x1cdd   :  { %2360 = vsyncpa [#allocation6], 1 }
0x1cde   :  { %2361 = vsyncpa [#allocation4], 1 }
0x1cdf   :  { %2363 = vsyncpa [#allocation4 + $0x1], 1 }

</bundles_post_ra>
